<compile_context>
chip_gen: v6e
topology: v6e:2x2x1
jax: 0.10.0
libtpu: 0.0.40
codegen_flags: <defaults>
</compile_context>

<pallas_src>
import functools
import math

import jax
import jax.numpy as jnp
from jax.experimental import pallas as pl
from jax.experimental.pallas import tpu as pltpu


# ---------------------------------------------------------------------------
# One-time probes / helpers.
# ---------------------------------------------------------------------------
def _probe_single_buffer():
    """Check once whether pipeline_mode=pl.Buffered(1) is supported on this jax/TPU."""
    if not hasattr(pl, "Buffered"):
        return False
    try:
        def _k(x_ref, w_ref, o_ref):
            o_ref[...] = x_ref[...] + w_ref[...]

        out = pl.pallas_call(
            _k,
            out_shape=jax.ShapeDtypeStruct((8, 128), jnp.float32),
            grid=(1,),
            in_specs=[pl.BlockSpec((8, 128), lambda i: (0, 0)),
                      pl.BlockSpec((8, 128), lambda i: (0, 0),
                                   pipeline_mode=pl.Buffered(1))],
            out_specs=pl.BlockSpec((8, 128), lambda i: (0, 0)),
        )(jnp.ones((8, 128), jnp.float32), jnp.full((8, 128), 2.0, jnp.float32))
        return bool(jnp.all(out == 3.0))
    except Exception:  # noqa: BLE001 - probe only; falls back to double buffering
        return False


_SINGLE_BUFFER_OK = _probe_single_buffer()


@functools.lru_cache(maxsize=None)
def _vmem_budget_bytes():
    """Generation-aware VMEM budget: v7x has 64 MiB per TC, v5e/v6e 128 MiB."""
    cap = 128 * 1024 * 1024
    try:
        cap = int(pltpu.get_tpu_info().vmem_capacity_bytes)
    except Exception:  # noqa: BLE001 - conservative default
        pass
    if cap <= 64 * 1024 * 1024:
        return 40 * 1024 * 1024   # v7x: leave headroom for compiler scratch
    return 96 * 1024 * 1024       # v5e / v6e


def _resident_spec(shape, single_buffer):
    """BlockSpec for a grid-invariant (resident) operand: constant index_map,
    optionally single-buffered (nothing to prefetch)."""
    idx = lambda i, _n=len(shape): (0,) * _n
    if single_buffer:
        return pl.BlockSpec(shape, idx, pipeline_mode=pl.Buffered(1))
    return pl.BlockSpec(shape, idx)


def _round_up(x, m):
    return ((x + m - 1) // m) * m


# ---------------------------------------------------------------------------
# Kernel 1: per-batch masked self-attention over the ne*ne "token" grid,
#           all heads fused, natural (S, d_model) layout.
# ---------------------------------------------------------------------------
def attention_kernel(x_ref, mcol_ref, mrow_ref, wqkv_ref, bqkv_ref, o_ref, *, h, dk):
    d = h * dk
    x = x_ref[...]                       # (S, d)
    m_col = mcol_ref[...]                # (S, 1)
    m_row = mrow_ref[...]                # (1, S)

    # Fused QKV projection: one MXU matmul against a block-diagonal (d, 3d) weight
    # (the dk x dk Linear is shared across heads).
    qkv = jnp.dot(x, wqkv_ref[...], preferred_element_type=jnp.float32) + bqkv_ref[...]

    inv_sqrt_dk = 1.0 / math.sqrt(dk)
    # (scores - (1-mask)*1e5)/sqrt(dk)  ==  (q*inv_sqrt_dk) @ k^T - (1-mask)*(1e5*inv_sqrt_dk)
    penalty = (1.0 - m_col * m_row) * (100000.0 * inv_sqrt_dk)      # (S, S), shared by heads

    outs = []
    for hh in range(h):                  # h is static and small
        q = qkv[:, hh * dk:(hh + 1) * dk] * inv_sqrt_dk
        k = qkv[:, d + hh * dk:d + (hh + 1) * dk]
        v = qkv[:, 2 * d + hh * dk:2 * d + (hh + 1) * dk]
        s = jax.lax.dot_general(q, k, (((1,), (1,)), ((), ())),
                                preferred_element_type=jnp.float32) - penalty
        s = s - jnp.max(s, axis=-1, keepdims=True)                  # stable softmax
        p = jnp.exp(s)
        p = p * pl.reciprocal(jnp.sum(p, axis=-1, keepdims=True))   # EUP recip + VPU mul
        outs.append(jnp.dot(p, v, preferred_element_type=jnp.float32))

    # TODO(synk): flash-style q-tiling (online softmax) for large ne so the (S,S) buffers
    # stay inside v7x's 64 MiB VMEM.
    o = jnp.concatenate(outs, axis=-1) * m_col                      # R_Z * R_mas, (S, d)
    o_ref[...] = o.astype(o_ref.dtype)


@functools.lru_cache(maxsize=None)
def _build_attention_call(bs, S, d, h, dk, dtype, single_buffer, vmem_limit):
    kernel = functools.partial(attention_kernel, h=h, dk=dk)
    res = functools.partial(_resident_spec, single_buffer=single_buffer)
    cost = pl.CostEstimate(
        flops=int(bs * (6 * S * d * d + 4 * S * S * d)),
        transcendentals=int(bs * h * (S * S + S)),
        bytes_accessed=int(4 * (bs * (2 * S * d + 2 * S) + 3 * d * d + 3 * d)),
    )
    return pl.pallas_call(
        kernel,
        out_shape=jax.ShapeDtypeStruct((bs, S, d), dtype),
        grid_spec=pltpu.PrefetchScalarGridSpec(
            num_scalar_prefetch=0,
            grid=(bs,),
            in_specs=[
                pl.BlockSpec((None, S, d), lambda b: (b, 0, 0)),   # x  (natural layout)
                pl.BlockSpec((None, S, 1), lambda b: (b, 0, 0)),   # mask, column view
                pl.BlockSpec((None, 1, S), lambda b: (b, 0, 0)),   # mask, row view
                res((d, 3 * d)),                                   # fused QKV weight (resident)
                res((1, 3 * d)),                                   # fused QKV bias   (resident)
            ],
            out_specs=pl.BlockSpec((None, S, d), lambda b: (b, 0, 0)),
        ),
        compiler_params=pltpu.CompilerParams(
            dimension_semantics=("parallel",),
            vmem_limit_bytes=vmem_limit),
        cost_estimate=cost,
    )


def attention_pallas(x, m_col, m_row, w_qkv, b_qkv, *, h, dk):
    """x: (bs, S, d); m_col: (bs, S, 1); m_row: (bs, 1, S); returns (bs, S, d)."""
    bs, S, d = x.shape
    call = _build_attention_call(bs, S, d, h, dk, x.dtype,
                                 _SINGLE_BUFFER_OK, _vmem_budget_bytes())
    return call(x, m_col, m_row, w_qkv, b_qkv)


# ---------------------------------------------------------------------------
# Kernel 2: fused residual + LayerNorm1 + FFN + mask + residual + LayerNorm2.
# ---------------------------------------------------------------------------
def _layernorm(x, g, b, eps=1e-5):
    mu = jnp.mean(x, axis=-1, keepdims=True)
    xc = x - mu
    var = jnp.mean(xc * xc, axis=-1, keepdims=True)
    return xc * jax.lax.rsqrt(var + eps) * g + b


def post_attention_kernel(rz_ref, r_ref, m_ref,
                          g1_ref, be1_ref, w1_ref, b1_ref,
                          w2_ref, b2_ref, g2_ref, be2_ref, o_ref):
    r1 = _layernorm(rz_ref[...] + r_ref[...], g1_ref[...], be1_ref[...])
    hidden = jnp.dot(r1, w1_ref[...], preferred_element_type=jnp.float32) + b1_ref[...]
    hidden = jnp.maximum(hidden, 0.0)                     # ReLU on the VPU
    y = jnp.dot(hidden, w2_ref[...], preferred_element_type=jnp.float32) + b2_ref[...]
    y = y * m_ref[...]                                    # FFN output * R_mas
    o_ref[...] = _layernorm(y + r1, g2_ref[...], be2_ref[...]).astype(o_ref.dtype)


def _pick_tm(M, D, H, itemsize=4):
    """Largest row tile that (a) divides M (no padding), (b) keeps >=2 grid steps when
    possible (feeds both v7x TensorCores), (c) fits the generation-aware VMEM budget."""
    budget = _vmem_budget_bytes()
    n_buf = 1 if _SINGLE_BUFFER_OK else 2

    def usage(t):
        resident = n_buf * (2 * D * H + 2 * H + 6 * D) * itemsize   # weights/biases/LN
        streamed = 2 * (3 * t * D + t) * itemsize                   # rz, r, out (2-buf) + mask
        interm = (t * H + 4 * t * D) * itemsize                     # hidden + temporaries
        return resident + streamed + interm

    cands = [t for t in range(8, min(M, 2048) + 1, 8) if M % t == 0]
    if not cands:                        # rare fallback -> padding path
        t = min(_round_up(M, 8), 512)
        while t > 8 and usage(t) > budget:
            t -= 8
        return t
    multi = [t for t in cands if t <= M // 2]
    pool = multi if multi else cands
    for t in sorted(pool, reverse=True):
        if usage(t) <= budget:
            return t
    return min(pool)


@functools.lru_cache(maxsize=None)
def _build_post_call(Mp, D, H, tm, dtype, single_buffer, vmem_limit):
    res = functools.partial(_resident_spec, single_buffer=single_buffer)
    cost = pl.CostEstimate(
        flops=int(4 * Mp * D * H + 20 * Mp * D),
        transcendentals=int(2 * Mp),
        bytes_accessed=int(4 * (3 * Mp * D + Mp + 2 * D * H + 2 * H + 6 * D)),
    )
    # TODO(synk): for large hidden sizes (2*D*H*4B beyond ~24 MiB on v7x) stream W1/W2 via an
    # H-reduction grid axis + VMEM accumulator instead of keeping them fully resident; for
    # production d_model >= 128 the output stores are already lane-dense.
    return pl.pallas_call(
        post_attention_kernel,
        out_shape=jax.ShapeDtypeStruct((Mp, D), dtype),
        grid_spec=pltpu.PrefetchScalarGridSpec(
            num_scalar_prefetch=0,
            grid=(Mp // tm,),
            in_specs=[
                pl.BlockSpec((tm, D), lambda i: (i, 0)),   # R_Z tile
                pl.BlockSpec((tm, D), lambda i: (i, 0)),   # R tile (residual)
                pl.BlockSpec((tm, 1), lambda i: (i, 0)),   # mask tile
                res((1, D)), res((1, D)),                  # LN1 gamma / beta
                res((D, H)), res((1, H)),                  # W1 / b1 (resident)
                res((H, D)), res((1, D)),                  # W2 / b2 (resident)
                res((1, D)), res((1, D)),                  # LN2 gamma / beta
            ],
            out_specs=pl.BlockSpec((tm, D), lambda i: (i, 0)),
        ),
        compiler_params=pltpu.CompilerParams(
            dimension_semantics=("parallel",),
            vmem_limit_bytes=vmem_limit),
        cost_estimate=cost,
    )


def post_attention_pallas(rz, r, m, g1, be1, w1, b1, w2, b2, g2, be2):
    M, D = rz.shape
    H = w1.shape[1]
    tm = _pick_tm(M, D, H)
    Mp = _round_up(M, tm)
    if Mp != M:                          # rare fallback; common path is pad-free
        pad = Mp - M
        rz = jnp.pad(rz, ((0, pad), (0, 0)))
        r = jnp.pad(r, ((0, pad), (0, 0)))
        m = jnp.pad(m, ((0, pad), (0, 0)))

    call = _build_post_call(Mp, D, H, tm, rz.dtype, _SINGLE_BUFFER_OK, _vmem_budget_bytes())
    out = call(rz, r, m,
               g1.reshape(1, D), be1.reshape(1, D),
               w1, b1.reshape(1, H), w2, b2.reshape(1, D),
               g2.reshape(1, D), be2.reshape(1, D))
    return out if Mp == M else out[:M]


# ---------------------------------------------------------------------------
# Full Encoder_Layer forward (dropout p=0.0 -> identity), jit'ed end-to-end.
# ---------------------------------------------------------------------------
def _fuse_qkv(wq, bq, wk, bk, wv, bv, h):
    """Build the block-diagonal (d, 3d) QKV weight and tiled (1, 3d) bias."""
    dk = wq.shape[0]
    d = h * dk

    def blockdiag(w):
        out = jnp.zeros((d, d), w.dtype)
        for i in range(h):
            out = out.at[i * dk:(i + 1) * dk, i * dk:(i + 1) * dk].set(w)
        return out

    w_qkv = jnp.concatenate([blockdiag(wq), blockdiag(wk), blockdiag(wv)], axis=1)
    b_qkv = jnp.concatenate([jnp.tile(bq, h), jnp.tile(bk, h), jnp.tile(bv, h)])
    return w_qkv, b_qkv.reshape(1, 3 * d)


@functools.partial(jax.jit, static_argnums=(3,))
def _encoder_layer_impl(R, R_mas, w, h):
    bs, ne, _, d = R.shape
    S = ne * ne
    dk = d // h

    # Natural layout: pure reshapes (views), no transposes around the kernels.
    x = R.reshape(bs, S, d)
    m_col = R_mas.reshape(bs, S, 1)
    m_row = R_mas.reshape(bs, 1, S)
    w_qkv, b_qkv = _fuse_qkv(w["wq"], w["bq"], w["wk"], w["bk"], w["wv"], w["bv"], h)

    rz = attention_pallas(x, m_col, m_row, w_qkv, b_qkv, h=h, dk=dk)      # (bs, S, d)

    out = post_attention_pallas(
        rz.reshape(bs * S, d), x.reshape(bs * S, d), R_mas.reshape(bs * S, 1),
        w["ln1_g"], w["ln1_b"], w["w1"], w["b1"], w["w2"], w["b2"],
        w["ln2_g"], w["ln2_b"])
    return out.reshape(bs, ne, ne, d)


def encoder_layer_pallas(R, R_mas, params):
    h = params["h"]
    weights = {k: v for k, v in params.items() if k != "h"}
    return _encoder_layer_impl(R, R_mas, weights, h)


# ---------------------------------------------------------------------------
# Pure-JAX reference (mirrors the PyTorch module exactly).
# ---------------------------------------------------------------------------
def encoder_layer_reference(R, R_mas, params):
    bs, ne, _, d = R.shape
    h = params["h"]
    dk = d // h
    S = ne * ne

    x = R.reshape(bs, ne, ne, h, dk).transpose(0, 3, 1, 2, 4).reshape(bs, h, S, dk)
    q = jnp.einsum("bhsd,de->bhse", x, params["wq"]) + params["bq"]
    k = jnp.einsum("bhsd,de->bhse", x, params["wk"]) + params["bk"]
    v = jnp.einsum("bhsd,de->bhse", x, params["wv"]) + params["bv"]
    mas = R_mas.reshape(bs, 1, S, 1)
    att_mas = mas * mas.reshape(bs, 1, 1, S)
    alpha = jnp.einsum("bhqd,bhkd->bhqk", q, k)
    alpha = alpha - (1.0 - att_mas) * 100000.0
    alpha = jax.nn.softmax(alpha / math.sqrt(dk), axis=-1)
    rz = jnp.einsum("bhqk,bhkd->bhqd", alpha, v) * mas
    rz = rz.transpose(0, 2, 1, 3).reshape(bs, ne, ne, d)

    def ln(t, g, b, eps=1e-5):
        mu = t.mean(-1, keepdims=True)
        var = ((t - mu) ** 2).mean(-1, keepdims=True)
        return (t - mu) / jnp.sqrt(var + eps) * g + b

    r1 = ln(rz + R, params["ln1_g"], params["ln1_b"])
    y = jnp.maximum(jnp.einsum("bijd,dh->bijh", r1, params["w1"]) + params["b1"], 0.0)
    y = jnp.einsum("bijh,hd->bijd", y, params["w2"]) + params["b2"]
    y = y * R_mas
    return ln(y + r1, params["ln2_g"], params["ln2_b"])


if __name__ == "__main__":
    bs, ne, h, d_model, hidden = 2, 4, 4, 32, 64
    dk = d_model // h

    key = jax.random.PRNGKey(0)
    keys = jax.random.split(key, 11)

    R = jax.random.normal(keys[0], (bs, ne, ne, d_model), dtype=jnp.float32)
    R_mas = (jax.random.uniform(keys[1], (bs, ne, ne, 1)) > 0.3).astype(jnp.float32)

    def xavier(k, shape):
        fan_in, fan_out = shape
        std = math.sqrt(2.0 / (fan_in + fan_out))
        return std * jax.random.normal(k, shape, dtype=jnp.float32)

    params = dict(
        h=h,
        # attention weights stored transposed: q = x @ wq + bq == nn.Linear(dk, dk)
        wq=xavier(keys[2], (dk, dk)), bq=jnp.zeros((dk,), jnp.float32),
        wk=xavier(keys[3], (dk, dk)), bk=jnp.zeros((dk,), jnp.float32),
        wv=xavier(keys[4], (dk, dk)), bv=jnp.zeros((dk,), jnp.float32),
        ln1_g=1.0 + 0.1 * jax.random.normal(keys[5], (d_model,), jnp.float32),
        ln1_b=0.1 * jax.random.normal(keys[6], (d_model,), jnp.float32),
        # FFN weights stored transposed: y = x @ w + b
        w1=xavier(keys[7], (d_model, hidden)), b1=jnp.zeros((hidden,), jnp.float32),
        w2=xavier(keys[8], (hidden, d_model)), b2=jnp.zeros((d_model,), jnp.float32),
        ln2_g=1.0 + 0.1 * jax.random.normal(keys[9], (d_model,), jnp.float32),
        ln2_b=0.1 * jax.random.normal(keys[10], (d_model,), jnp.float32),
    )

    out = encoder_layer_pallas(R, R_mas, params)
    out = jax.block_until_ready(out)

    ref = encoder_layer_reference(R, R_mas, params)
    assert out.shape == (bs, ne, ne, d_model)
    max_err = jnp.max(jnp.abs(out - ref))
    assert jnp.allclose(out, ref, atol=1e-4, rtol=1e-4), f"mismatch vs reference (max abs err {max_err})"

    print("KERNEL_OK")
</pallas_src>

<mosaic_0001>
module attributes {stable_mosaic.version = 11 : i64} {
  func.func @_k(%arg0: i32, %arg1: memref<8x128xf32, #tpu.memory_space<vmem>>, %arg2: memref<8x128xf32, #tpu.memory_space<vmem>>, %arg3: memref<8x128xf32, #tpu.memory_space<vmem>>) attributes {dimension_semantics = [#tpu.dimension_semantics<arbitrary>], iteration_bounds = array<i64: 1>, scalar_prefetch = 0 : i64, scratch_operands = 0 : i64, tpu.core_type = #tpu.core_type<tc>, window_params = [{pipeline_mode = #tpu.pipeline_mode<synchronous>, transform_indices = @transform_0, window_bounds = array<i64: 8, 128>}, {pipeline_mode = #tpu.pipeline_mode<synchronous>, transform_indices = @transform_1, window_bounds = array<i64: 8, 128>}, {pipeline_mode = #tpu.pipeline_mode<synchronous>, transform_indices = @transform_2, window_bounds = array<i64: 8, 128>}]} {
    %c0 = arith.constant 0 : index
    %c0_0 = arith.constant 0 : index
    %0 = vector.load %arg1[%c0, %c0_0] : memref<8x128xf32, #tpu.memory_space<vmem>>, vector<8x128xf32>
    %c0_1 = arith.constant 0 : index
    %c0_2 = arith.constant 0 : index
    %1 = vector.load %arg2[%c0_1, %c0_2] : memref<8x128xf32, #tpu.memory_space<vmem>>, vector<8x128xf32>
    %2 = arith.addf %0, %1 : vector<8x128xf32>
    %c0_3 = arith.constant 0 : index
    %c0_4 = arith.constant 0 : index
    %3 = vector.load %arg3[%c0_3, %c0_4] : memref<8x128xf32, #tpu.memory_space<vmem>>, vector<8x128xf32>
    tpu.vector_store %arg3[%c0_3, %c0_4], %2 {strides = array<i32>} : memref<8x128xf32, #tpu.memory_space<vmem>>, vector<8x128xf32>,
    return
  }
  func.func @transform_0(%arg0: i32) -> (i32, i32) {
    %c0_i32 = arith.constant 0 : i32
    %c0_i32_0 = arith.constant 0 : i32
    %c0_i32_1 = arith.constant 0 : i32
    return %c0_i32, %c0_i32_0 : i32, i32
  }
  func.func @transform_1(%arg0: i32) -> (i32, i32) {
    %c0_i32 = arith.constant 0 : i32
    %c0_i32_0 = arith.constant 0 : i32
    %c0_i32_1 = arith.constant 0 : i32
    return %c0_i32, %c0_i32_0 : i32, i32
  }
  func.func @transform_2(%arg0: i32) -> (i32, i32) {
    %c0_i32 = arith.constant 0 : i32
    %c0_i32_0 = arith.constant 0 : i32
    %c0_i32_1 = arith.constant 0 : i32
    return %c0_i32, %c0_i32_0 : i32, i32
  }
}

module attributes {stable_mosaic.version = 11 : i64} {
  func.func @post_attention_kernel(%arg0: i32, %arg1: memref<16x32xf32, #tpu.memory_space<vmem>>, %arg2: memref<16x32xf32, #tpu.memory_space<vmem>>, %arg3: memref<16x1xf32, #tpu.memory_space<vmem>>, %arg4: memref<1x32xf32, #tpu.memory_space<vmem>>, %arg5: memref<1x32xf32, #tpu.memory_space<vmem>>, %arg6: memref<32x64xf32, #tpu.memory_space<vmem>>, %arg7: memref<1x64xf32, #tpu.memory_space<vmem>>, %arg8: memref<64x32xf32, #tpu.memory_space<vmem>>, %arg9: memref<1x32xf32, #tpu.memory_space<vmem>>, %arg10: memref<1x32xf32, #tpu.memory_space<vmem>>, %arg11: memref<1x32xf32, #tpu.memory_space<vmem>>, %arg12: memref<16x32xf32, #tpu.memory_space<vmem>>) attributes {dimension_semantics = [#tpu.dimension_semantics<parallel>], iteration_bounds = array<i64: 2>, scalar_prefetch = 0 : i64, scratch_operands = 0 : i64, tpu.core_type = #tpu.core_type<tc>, window_params = [{transform_indices = @transform_0, window_bounds = array<i64: 16, 32>}, {transform_indices = @transform_1, window_bounds = array<i64: 16, 32>}, {transform_indices = @transform_2, window_bounds = array<i64: 16, 1>}, {pipeline_mode = #tpu.pipeline_mode<synchronous>, transform_indices = @transform_3, window_bounds = array<i64: 1, 32>}, {pipeline_mode = #tpu.pipeline_mode<synchronous>, transform_indices = @transform_4, window_bounds = array<i64: 1, 32>}, {pipeline_mode = #tpu.pipeline_mode<synchronous>, transform_indices = @transform_5, window_bounds = array<i64: 32, 64>}, {pipeline_mode = #tpu.pipeline_mode<synchronous>, transform_indices = @transform_6, window_bounds = array<i64: 1, 64>}, {pipeline_mode = #tpu.pipeline_mode<synchronous>, transform_indices = @transform_7, window_bounds = array<i64: 64, 32>}, {pipeline_mode = #tpu.pipeline_mode<synchronous>, transform_indices = @transform_8, window_bounds = array<i64: 1, 32>}, {pipeline_mode = #tpu.pipeline_mode<synchronous>, transform_indices = @transform_9, window_bounds = array<i64: 1, 32>}, {pipeline_mode = #tpu.pipeline_mode<synchronous>, transform_indices = @transform_10, window_bounds = array<i64: 1, 32>}, {transform_indices = @transform_11, window_bounds = array<i64: 16, 32>}]} {
    %c0 = arith.constant 0 : index
    %c0_0 = arith.constant 0 : index
    %0 = vector.load %arg1[%c0, %c0_0] : memref<16x32xf32, #tpu.memory_space<vmem>>, vector<16x32xf32>
    %c0_1 = arith.constant 0 : index
    %c0_2 = arith.constant 0 : index
    %1 = vector.load %arg2[%c0_1, %c0_2] : memref<16x32xf32, #tpu.memory_space<vmem>>, vector<16x32xf32>
    %2 = arith.addf %0, %1 : vector<16x32xf32>
    %c0_3 = arith.constant 0 : index
    %c0_4 = arith.constant 0 : index
    %3 = vector.load %arg4[%c0_3, %c0_4] : memref<1x32xf32, #tpu.memory_space<vmem>>, vector<1x32xf32>
    %c0_5 = arith.constant 0 : index
    %c0_6 = arith.constant 0 : index
    %4 = vector.load %arg5[%c0_5, %c0_6] : memref<1x32xf32, #tpu.memory_space<vmem>>, vector<1x32xf32>
    %cst = arith.constant dense<0.000000e+00> : vector<16xf32>
    %5 = vector.multi_reduction <add>, %2, %cst [1] : vector<16x32xf32> to vector<16xf32>
    %6 = vector.shape_cast %5 : vector<16xf32> to vector<16x1xf32>
    %cst_7 = arith.constant 3.200000e+01 : f32
    %7 = vector.broadcast %cst_7 : f32 to vector<16x1xf32>
    %8 = arith.divf %6, %7 : vector<16x1xf32>
    %9 = vector.broadcast %8 : vector<16x1xf32> to vector<16x32xf32>
    %10 = arith.subf %2, %9 : vector<16x32xf32>
    %11 = arith.mulf %10, %10 : vector<16x32xf32>
    %cst_8 = arith.constant dense<0.000000e+00> : vector<16xf32>
    %12 = vector.multi_reduction <add>, %11, %cst_8 [1] : vector<16x32xf32> to vector<16xf32>
    %13 = vector.shape_cast %12 : vector<16xf32> to vector<16x1xf32>
    %cst_9 = arith.constant 3.200000e+01 : f32
    %14 = vector.broadcast %cst_9 : f32 to vector<16x1xf32>
    %15 = arith.divf %13, %14 : vector<16x1xf32>
    %cst_10 = arith.constant 9.99999974E-6 : f32
    %16 = vector.broadcast %cst_10 : f32 to vector<16x1xf32>
    %17 = arith.addf %15, %16 : vector<16x1xf32>
    %18 = math.rsqrt %17 : vector<16x1xf32>
    %19 = vector.broadcast %18 : vector<16x1xf32> to vector<16x32xf32>
    %20 = arith.mulf %10, %19 : vector<16x32xf32>
    %21 = vector.broadcast %3 : vector<1x32xf32> to vector<16x32xf32>
    %22 = arith.mulf %20, %21 : vector<16x32xf32>
    %23 = vector.broadcast %4 : vector<1x32xf32> to vector<16x32xf32>
    %24 = arith.addf %22, %23 : vector<16x32xf32>
    %c0_11 = arith.constant 0 : index
    %c0_12 = arith.constant 0 : index
    %25 = vector.load %arg6[%c0_11, %c0_12] : memref<32x64xf32, #tpu.memory_space<vmem>>, vector<32x64xf32>
    %cst_13 = arith.constant dense<0.000000e+00> : vector<16x64xf32>
    %26 = tpu.matmul %24, %25, %cst_13 {dimension_numbers = #tpu.dot_dimension_numbers<[1], [0], [0], [1], [0, 0, 1, 1], [], []>} : vector<16x32xf32>, vector<32x64xf32>, vector<16x64xf32> -> vector<16x64xf32>
    %c0_14 = arith.constant 0 : index
    %c0_15 = arith.constant 0 : index
    %27 = vector.load %arg7[%c0_14, %c0_15] : memref<1x64xf32, #tpu.memory_space<vmem>>, vector<1x64xf32>
    %28 = vector.broadcast %27 : vector<1x64xf32> to vector<16x64xf32>
    %29 = arith.addf %26, %28 : vector<16x64xf32>
    %cst_16 = arith.constant 0.000000e+00 : f32
    %30 = vector.broadcast %cst_16 : f32 to vector<16x64xf32>
    %31 = arith.maximumf %29, %30 : vector<16x64xf32>
    %c0_17 = arith.constant 0 : index
    %c0_18 = arith.constant 0 : index
    %32 = vector.load %arg8[%c0_17, %c0_18] : memref<64x32xf32, #tpu.memory_space<vmem>>, vector<64x32xf32>
    %cst_19 = arith.constant dense<0.000000e+00> : vector<16x32xf32>
    %33 = tpu.matmul %31, %32, %cst_19 {dimension_numbers = #tpu.dot_dimension_numbers<[1], [0], [0], [1], [0, 0, 1, 1], [], []>} : vector<16x64xf32>, vector<64x32xf32>, vector<16x32xf32> -> vector<16x32xf32>
    %c0_20 = arith.constant 0 : index
    %c0_21 = arith.constant 0 : index
    %34 = vector.load %arg9[%c0_20, %c0_21] : memref<1x32xf32, #tpu.memory_space<vmem>>, vector<1x32xf32>
    %35 = vector.broadcast %34 : vector<1x32xf32> to vector<16x32xf32>
    %36 = arith.addf %33, %35 : vector<16x32xf32>
    %c0_22 = arith.constant 0 : index
    %c0_23 = arith.constant 0 : index
    %37 = vector.load %arg3[%c0_22, %c0_23] : memref<16x1xf32, #tpu.memory_space<vmem>>, vector<16x1xf32>
    %38 = vector.broadcast %37 : vector<16x1xf32> to vector<16x32xf32>
    %39 = arith.mulf %36, %38 : vector<16x32xf32>
    %40 = arith.addf %39, %24 : vector<16x32xf32>
    %c0_24 = arith.constant 0 : index
    %c0_25 = arith.constant 0 : index
    %41 = vector.load %arg10[%c0_24, %c0_25] : memref<1x32xf32, #tpu.memory_space<vmem>>, vector<1x32xf32>
    %c0_26 = arith.constant 0 : index
    %c0_27 = arith.constant 0 : index
    %42 = vector.load %arg11[%c0_26, %c0_27] : memref<1x32xf32, #tpu.memory_space<vmem>>, vector<1x32xf32>
    %cst_28 = arith.constant dense<0.000000e+00> : vector<16xf32>
    %43 = vector.multi_reduction <add>, %40, %cst_28 [1] : vector<16x32xf32> to vector<16xf32>
    %44 = vector.shape_cast %43 : vector<16xf32> to vector<16x1xf32>
    %cst_29 = arith.constant 3.200000e+01 : f32
    %45 = vector.broadcast %cst_29 : f32 to vector<16x1xf32>
    %46 = arith.divf %44, %45 : vector<16x1xf32>
    %47 = vector.broadcast %46 : vector<16x1xf32> to vector<16x32xf32>
    %48 = arith.subf %40, %47 : vector<16x32xf32>
    %49 = arith.mulf %48, %48 : vector<16x32xf32>
    %cst_30 = arith.constant dense<0.000000e+00> : vector<16xf32>
    %50 = vector.multi_reduction <add>, %49, %cst_30 [1] : vector<16x32xf32> to vector<16xf32>
    %51 = vector.shape_cast %50 : vector<16xf32> to vector<16x1xf32>
    %cst_31 = arith.constant 3.200000e+01 : f32
    %52 = vector.broadcast %cst_31 : f32 to vector<16x1xf32>
    %53 = arith.divf %51, %52 : vector<16x1xf32>
    %cst_32 = arith.constant 9.99999974E-6 : f32
    %54 = vector.broadcast %cst_32 : f32 to vector<16x1xf32>
    %55 = arith.addf %53, %54 : vector<16x1xf32>
    %56 = math.rsqrt %55 : vector<16x1xf32>
    %57 = vector.broadcast %56 : vector<16x1xf32> to vector<16x32xf32>
    %58 = arith.mulf %48, %57 : vector<16x32xf32>
    %59 = vector.broadcast %41 : vector<1x32xf32> to vector<16x32xf32>
    %60 = arith.mulf %58, %59 : vector<16x32xf32>
    %61 = vector.broadcast %42 : vector<1x32xf32> to vector<16x32xf32>
    %62 = arith.addf %60, %61 : vector<16x32xf32>
    %c0_33 = arith.constant 0 : index
    %c0_34 = arith.constant 0 : index
    %63 = vector.load %arg12[%c0_33, %c0_34] : memref<16x32xf32, #tpu.memory_space<vmem>>, vector<16x32xf32>
    tpu.vector_store %arg12[%c0_33, %c0_34], %62 {strides = array<i32>} : memref<16x32xf32, #tpu.memory_space<vmem>>, vector<16x32xf32>,
    return
  }
  func.func @transform_0(%arg0: i32) -> (i32, i32) {
    %c0_i32 = arith.constant 0 : i32
    %c0_i32_0 = arith.constant 0 : i32
    return %arg0, %c0_i32 : i32, i32
  }
  func.func @transform_1(%arg0: i32) -> (i32, i32) {
    %c0_i32 = arith.constant 0 : i32
    %c0_i32_0 = arith.constant 0 : i32
    return %arg0, %c0_i32 : i32, i32
  }
  func.func @transform_2(%arg0: i32) -> (i32, i32) {
    %c0_i32 = arith.constant 0 : i32
    %c0_i32_0 = arith.constant 0 : i32
    return %arg0, %c0_i32 : i32, i32
  }
  func.func @transform_3(%arg0: i32) -> (i32, i32) {
    %c0_i32 = arith.constant 0 : i32
    %c0_i32_0 = arith.constant 0 : i32
    %c0_i32_1 = arith.constant 0 : i32
    return %c0_i32, %c0_i32_0 : i32, i32
  }
  func.func @transform_4(%arg0: i32) -> (i32, i32) {
    %c0_i32 = arith.constant 0 : i32
    %c0_i32_0 = arith.constant 0 : i32
    %c0_i32_1 = arith.constant 0 : i32
    return %c0_i32, %c0_i32_0 : i32, i32
  }
  func.func @transform_5(%arg0: i32) -> (i32, i32) {
    %c0_i32 = arith.constant 0 : i32
    %c0_i32_0 = arith.constant 0 : i32
    %c0_i32_1 = arith.constant 0 : i32
    return %c0_i32, %c0_i32_0 : i32, i32
  }
  func.func @transform_6(%arg0: i32) -> (i32, i32) {
    %c0_i32 = arith.constant 0 : i32
    %c0_i32_0 = arith.constant 0 : i32
    %c0_i32_1 = arith.constant 0 : i32
    return %c0_i32, %c0_i32_0 : i32, i32
  }
  func.func @transform_7(%arg0: i32) -> (i32, i32) {
    %c0_i32 = arith.constant 0 : i32
    %c0_i32_0 = arith.constant 0 : i32
    %c0_i32_1 = arith.constant 0 : i32
    return %c0_i32, %c0_i32_0 : i32, i32
  }
  func.func @transform_8(%arg0: i32) -> (i32, i32) {
    %c0_i32 = arith.constant 0 : i32
    %c0_i32_0 = arith.constant 0 : i32
    %c0_i32_1 = arith.constant 0 : i32
    return %c0_i32, %c0_i32_0 : i32, i32
  }
  func.func @transform_9(%arg0: i32) -> (i32, i32) {
    %c0_i32 = arith.constant 0 : i32
    %c0_i32_0 = arith.constant 0 : i32
    %c0_i32_1 = arith.constant 0 : i32
    return %c0_i32, %c0_i32_0 : i32, i32
  }
  func.func @transform_10(%arg0: i32) -> (i32, i32) {
    %c0_i32 = arith.constant 0 : i32
    %c0_i32_0 = arith.constant 0 : i32
    %c0_i32_1 = arith.constant 0 : i32
    return %c0_i32, %c0_i32_0 : i32, i32
  }
  func.func @transform_11(%arg0: i32) -> (i32, i32) {
    %c0_i32 = arith.constant 0 : i32
    %c0_i32_0 = arith.constant 0 : i32
    return %arg0, %c0_i32 : i32, i32
  }
}

module attributes {stable_mosaic.version = 11 : i64} {
  func.func @attention_kernel(%arg0: i32, %arg1: memref<1x16x32xf32, #tpu.memory_space<vmem>>, %arg2: memref<1x16x1xf32, #tpu.memory_space<vmem>>, %arg3: memref<1x1x16xf32, #tpu.memory_space<vmem>>, %arg4: memref<32x96xf32, #tpu.memory_space<vmem>>, %arg5: memref<1x96xf32, #tpu.memory_space<vmem>>, %arg6: memref<1x16x32xf32, #tpu.memory_space<vmem>>) attributes {dimension_semantics = [#tpu.dimension_semantics<parallel>], iteration_bounds = array<i64: 2>, scalar_prefetch = 0 : i64, scratch_operands = 0 : i64, tpu.core_type = #tpu.core_type<tc>, window_params = [{transform_indices = @transform_0, window_bounds = array<i64: 1, 16, 32>}, {transform_indices = @transform_1, window_bounds = array<i64: 1, 16, 1>}, {transform_indices = @transform_2, window_bounds = array<i64: 1, 1, 16>}, {pipeline_mode = #tpu.pipeline_mode<synchronous>, transform_indices = @transform_3, window_bounds = array<i64: 32, 96>}, {pipeline_mode = #tpu.pipeline_mode<synchronous>, transform_indices = @transform_4, window_bounds = array<i64: 1, 96>}, {transform_indices = @transform_5, window_bounds = array<i64: 1, 16, 32>}]} {
    %c0 = arith.constant 0 : index
    %c0_0 = arith.constant 0 : index
    %c0_1 = arith.constant 0 : index
    %0 = vector.load %arg1[%c0, %c0_0, %c0_1] : memref<1x16x32xf32, #tpu.memory_space<vmem>>, vector<1x16x32xf32>
    %1 = vector.shape_cast %0 : vector<1x16x32xf32> to vector<16x32xf32>
    %c0_2 = arith.constant 0 : index
    %c0_3 = arith.constant 0 : index
    %c0_4 = arith.constant 0 : index
    %2 = vector.load %arg2[%c0_2, %c0_3, %c0_4] : memref<1x16x1xf32, #tpu.memory_space<vmem>>, vector<1x16x1xf32>
    %3 = vector.shape_cast %2 : vector<1x16x1xf32> to vector<16x1xf32>
    %c0_5 = arith.constant 0 : index
    %c0_6 = arith.constant 0 : index
    %c0_7 = arith.constant 0 : index
    %4 = vector.load %arg3[%c0_5, %c0_6, %c0_7] : memref<1x1x16xf32, #tpu.memory_space<vmem>>, vector<1x1x16xf32>
    %5 = vector.shape_cast %4 : vector<1x1x16xf32> to vector<1x16xf32>
    %c0_8 = arith.constant 0 : index
    %c0_9 = arith.constant 0 : index
    %6 = vector.load %arg4[%c0_8, %c0_9] : memref<32x96xf32, #tpu.memory_space<vmem>>, vector<32x96xf32>
    %cst = arith.constant dense<0.000000e+00> : vector<16x96xf32>
    %7 = tpu.matmul %1, %6, %cst {dimension_numbers = #tpu.dot_dimension_numbers<[1], [0], [0], [1], [0, 0, 1, 1], [], []>} : vector<16x32xf32>, vector<32x96xf32>, vector<16x96xf32> -> vector<16x96xf32>
    %c0_10 = arith.constant 0 : index
    %c0_11 = arith.constant 0 : index
    %8 = vector.load %arg5[%c0_10, %c0_11] : memref<1x96xf32, #tpu.memory_space<vmem>>, vector<1x96xf32>
    %9 = vector.broadcast %8 : vector<1x96xf32> to vector<16x96xf32>
    %10 = arith.addf %7, %9 : vector<16x96xf32>
    %11 = vector.broadcast %3 : vector<16x1xf32> to vector<16x16xf32>
    %12 = vector.broadcast %5 : vector<1x16xf32> to vector<16x16xf32>
    %13 = arith.mulf %11, %12 : vector<16x16xf32>
    %cst_12 = arith.constant 1.000000e+00 : f32
    %14 = vector.broadcast %cst_12 : f32 to vector<16x16xf32>
    %15 = arith.subf %14, %13 : vector<16x16xf32>
    %cst_13 = arith.constant 35355.3398 : f32
    %16 = vector.broadcast %cst_13 : f32 to vector<16x16xf32>
    %17 = arith.mulf %15, %16 : vector<16x16xf32>
    %18 = vector.extract_strided_slice %10 {offsets = [0, 0], sizes = [16, 8], strides = [1, 1]} : vector<16x96xf32> to vector<16x8xf32>
    %cst_14 = arith.constant 0.353553385 : f32
    %19 = vector.broadcast %cst_14 : f32 to vector<16x8xf32>
    %20 = arith.mulf %18, %19 : vector<16x8xf32>
    %21 = vector.extract_strided_slice %10 {offsets = [0, 32], sizes = [16, 8], strides = [1, 1]} : vector<16x96xf32> to vector<16x8xf32>
    %22 = vector.extract_strided_slice %10 {offsets = [0, 64], sizes = [16, 8], strides = [1, 1]} : vector<16x96xf32> to vector<16x8xf32>
    %cst_15 = arith.constant dense<0.000000e+00> : vector<16x16xf32>
    %23 = tpu.matmul %20, %21, %cst_15 {dimension_numbers = #tpu.dot_dimension_numbers<[1], [1], [0], [0], [0, 0, 1, 0], [], []>} : vector<16x8xf32>, vector<16x8xf32>, vector<16x16xf32> -> vector<16x16xf32>
    %24 = arith.subf %23, %17 : vector<16x16xf32>
    %cst_16 = arith.constant dense<0xFF800000> : vector<16xf32>
    %25 = vector.multi_reduction <maximumf>, %24, %cst_16 [1] : vector<16x16xf32> to vector<16xf32>
    %26 = vector.shape_cast %25 : vector<16xf32> to vector<16x1xf32>
    %27 = vector.broadcast %26 : vector<16x1xf32> to vector<16x16xf32>
    %28 = arith.subf %24, %27 : vector<16x16xf32>
    %29 = math.exp %28 : vector<16x16xf32>
    %cst_17 = arith.constant dense<0.000000e+00> : vector<16xf32>
    %30 = vector.multi_reduction <add>, %29, %cst_17 [1] : vector<16x16xf32> to vector<16xf32>
    %31 = vector.shape_cast %30 : vector<16xf32> to vector<16x1xf32>
    %32 = tpu.reciprocal %31 : vector<16x1xf32> -> vector<16x1xf32>
    %33 = vector.broadcast %32 : vector<16x1xf32> to vector<16x16xf32>
    %34 = arith.mulf %29, %33 : vector<16x16xf32>
    %cst_18 = arith.constant dense<0.000000e+00> : vector<16x8xf32>
    %35 = tpu.matmul %34, %22, %cst_18 {dimension_numbers = #tpu.dot_dimension_numbers<[1], [0], [0], [1], [0, 0, 1, 1], [], []>} : vector<16x16xf32>, vector<16x8xf32>, vector<16x8xf32> -> vector<16x8xf32>
    %36 = vector.extract_strided_slice %10 {offsets = [0, 8], sizes = [16, 8], strides = [1, 1]} : vector<16x96xf32> to vector<16x8xf32>
    %cst_19 = arith.constant 0.353553385 : f32
    %37 = vector.broadcast %cst_19 : f32 to vector<16x8xf32>
    %38 = arith.mulf %36, %37 : vector<16x8xf32>
    %39 = vector.extract_strided_slice %10 {offsets = [0, 40], sizes = [16, 8], strides = [1, 1]} : vector<16x96xf32> to vector<16x8xf32>
    %40 = vector.extract_strided_slice %10 {offsets = [0, 72], sizes = [16, 8], strides = [1, 1]} : vector<16x96xf32> to vector<16x8xf32>
    %cst_20 = arith.constant dense<0.000000e+00> : vector<16x16xf32>
    %41 = tpu.matmul %38, %39, %cst_20 {dimension_numbers = #tpu.dot_dimension_numbers<[1], [1], [0], [0], [0, 0, 1, 0], [], []>} : vector<16x8xf32>, vector<16x8xf32>, vector<16x16xf32> -> vector<16x16xf32>
    %42 = arith.subf %41, %17 : vector<16x16xf32>
    %cst_21 = arith.constant dense<0xFF800000> : vector<16xf32>
    %43 = vector.multi_reduction <maximumf>, %42, %cst_21 [1] : vector<16x16xf32> to vector<16xf32>
    %44 = vector.shape_cast %43 : vector<16xf32> to vector<16x1xf32>
    %45 = vector.broadcast %44 : vector<16x1xf32> to vector<16x16xf32>
    %46 = arith.subf %42, %45 : vector<16x16xf32>
    %47 = math.exp %46 : vector<16x16xf32>
    %cst_22 = arith.constant dense<0.000000e+00> : vector<16xf32>
    %48 = vector.multi_reduction <add>, %47, %cst_22 [1] : vector<16x16xf32> to vector<16xf32>
    %49 = vector.shape_cast %48 : vector<16xf32> to vector<16x1xf32>
    %50 = tpu.reciprocal %49 : vector<16x1xf32> -> vector<16x1xf32>
    %51 = vector.broadcast %50 : vector<16x1xf32> to vector<16x16xf32>
    %52 = arith.mulf %47, %51 : vector<16x16xf32>
    %cst_23 = arith.constant dense<0.000000e+00> : vector<16x8xf32>
    %53 = tpu.matmul %52, %40, %cst_23 {dimension_numbers = #tpu.dot_dimension_numbers<[1], [0], [0], [1], [0, 0, 1, 1], [], []>} : vector<16x16xf32>, vector<16x8xf32>, vector<16x8xf32> -> vector<16x8xf32>
    %54 = vector.extract_strided_slice %10 {offsets = [0, 16], sizes = [16, 8], strides = [1, 1]} : vector<16x96xf32> to vector<16x8xf32>
    %cst_24 = arith.constant 0.353553385 : f32
    %55 = vector.broadcast %cst_24 : f32 to vector<16x8xf32>
    %56 = arith.mulf %54, %55 : vector<16x8xf32>
    %57 = vector.extract_strided_slice %10 {offsets = [0, 48], sizes = [16, 8], strides = [1, 1]} : vector<16x96xf32> to vector<16x8xf32>
    %58 = vector.extract_strided_slice %10 {offsets = [0, 80], sizes = [16, 8], strides = [1, 1]} : vector<16x96xf32> to vector<16x8xf32>
    %cst_25 = arith.constant dense<0.000000e+00> : vector<16x16xf32>
    %59 = tpu.matmul %56, %57, %cst_25 {dimension_numbers = #tpu.dot_dimension_numbers<[1], [1], [0], [0], [0, 0, 1, 0], [], []>} : vector<16x8xf32>, vector<16x8xf32>, vector<16x16xf32> -> vector<16x16xf32>
    %60 = arith.subf %59, %17 : vector<16x16xf32>
    %cst_26 = arith.constant dense<0xFF800000> : vector<16xf32>
    %61 = vector.multi_reduction <maximumf>, %60, %cst_26 [1] : vector<16x16xf32> to vector<16xf32>
    %62 = vector.shape_cast %61 : vector<16xf32> to vector<16x1xf32>
    %63 = vector.broadcast %62 : vector<16x1xf32> to vector<16x16xf32>
    %64 = arith.subf %60, %63 : vector<16x16xf32>
    %65 = math.exp %64 : vector<16x16xf32>
    %cst_27 = arith.constant dense<0.000000e+00> : vector<16xf32>
    %66 = vector.multi_reduction <add>, %65, %cst_27 [1] : vector<16x16xf32> to vector<16xf32>
    %67 = vector.shape_cast %66 : vector<16xf32> to vector<16x1xf32>
    %68 = tpu.reciprocal %67 : vector<16x1xf32> -> vector<16x1xf32>
    %69 = vector.broadcast %68 : vector<16x1xf32> to vector<16x16xf32>
    %70 = arith.mulf %65, %69 : vector<16x16xf32>
    %cst_28 = arith.constant dense<0.000000e+00> : vector<16x8xf32>
    %71 = tpu.matmul %70, %58, %cst_28 {dimension_numbers = #tpu.dot_dimension_numbers<[1], [0], [0], [1], [0, 0, 1, 1], [], []>} : vector<16x16xf32>, vector<16x8xf32>, vector<16x8xf32> -> vector<16x8xf32>
    %72 = vector.extract_strided_slice %10 {offsets = [0, 24], sizes = [16, 8], strides = [1, 1]} : vector<16x96xf32> to vector<16x8xf32>
    %cst_29 = arith.constant 0.353553385 : f32
    %73 = vector.broadcast %cst_29 : f32 to vector<16x8xf32>
    %74 = arith.mulf %72, %73 : vector<16x8xf32>
    %75 = vector.extract_strided_slice %10 {offsets = [0, 56], sizes = [16, 8], strides = [1, 1]} : vector<16x96xf32> to vector<16x8xf32>
    %76 = vector.extract_strided_slice %10 {offsets = [0, 88], sizes = [16, 8], strides = [1, 1]} : vector<16x96xf32> to vector<16x8xf32>
    %cst_30 = arith.constant dense<0.000000e+00> : vector<16x16xf32>
    %77 = tpu.matmul %74, %75, %cst_30 {dimension_numbers = #tpu.dot_dimension_numbers<[1], [1], [0], [0], [0, 0, 1, 0], [], []>} : vector<16x8xf32>, vector<16x8xf32>, vector<16x16xf32> -> vector<16x16xf32>
    %78 = arith.subf %77, %17 : vector<16x16xf32>
    %cst_31 = arith.constant dense<0xFF800000> : vector<16xf32>
    %79 = vector.multi_reduction <maximumf>, %78, %cst_31 [1] : vector<16x16xf32> to vector<16xf32>
    %80 = vector.shape_cast %79 : vector<16xf32> to vector<16x1xf32>
    %81 = vector.broadcast %80 : vector<16x1xf32> to vector<16x16xf32>
    %82 = arith.subf %78, %81 : vector<16x16xf32>
    %83 = math.exp %82 : vector<16x16xf32>
    %cst_32 = arith.constant dense<0.000000e+00> : vector<16xf32>
    %84 = vector.multi_reduction <add>, %83, %cst_32 [1] : vector<16x16xf32> to vector<16xf32>
    %85 = vector.shape_cast %84 : vector<16xf32> to vector<16x1xf32>
    %86 = tpu.reciprocal %85 : vector<16x1xf32> -> vector<16x1xf32>
    %87 = vector.broadcast %86 : vector<16x1xf32> to vector<16x16xf32>
    %88 = arith.mulf %83, %87 : vector<16x16xf32>
    %cst_33 = arith.constant dense<0.000000e+00> : vector<16x8xf32>
    %89 = tpu.matmul %88, %76, %cst_33 {dimension_numbers = #tpu.dot_dimension_numbers<[1], [0], [0], [1], [0, 0, 1, 1], [], []>} : vector<16x16xf32>, vector<16x8xf32>, vector<16x8xf32> -> vector<16x8xf32>
    %90 = tpu.concatenate %35, %53, %71, %89 in 1 : vector<16x8xf32>, vector<16x8xf32>, vector<16x8xf32>, vector<16x8xf32> -> vector<16x32xf32>
    %91 = vector.broadcast %3 : vector<16x1xf32> to vector<16x32xf32>
    %92 = arith.mulf %90, %91 : vector<16x32xf32>
    %c0_34 = arith.constant 0 : index
    %c0_35 = arith.constant 0 : index
    %c0_36 = arith.constant 0 : index
    %93 = vector.load %arg6[%c0_34, %c0_35, %c0_36] : memref<1x16x32xf32, #tpu.memory_space<vmem>>, vector<1x16x32xf32>
    %94 = vector.shape_cast %93 : vector<1x16x32xf32> to vector<16x32xf32>
    %95 = vector.shape_cast %92 : vector<16x32xf32> to vector<1x16x32xf32>
    tpu.vector_store %arg6[%c0_34, %c0_35, %c0_36], %95 {strides = array<i32>} : memref<1x16x32xf32, #tpu.memory_space<vmem>>, vector<1x16x32xf32>,
    return
  }
  func.func @transform_0(%arg0: i32) -> (i32, i32, i32) {
    %c0_i32 = arith.constant 0 : i32
    %c0_i32_0 = arith.constant 0 : i32
    %c0_i32_1 = arith.constant 0 : i32
    return %arg0, %c0_i32, %c0_i32_0 : i32, i32, i32
  }
  func.func @transform_1(%arg0: i32) -> (i32, i32, i32) {
    %c0_i32 = arith.constant 0 : i32
    %c0_i32_0 = arith.constant 0 : i32
    %c0_i32_1 = arith.constant 0 : i32
    return %arg0, %c0_i32, %c0_i32_0 : i32, i32, i32
  }
  func.func @transform_2(%arg0: i32) -> (i32, i32, i32) {
    %c0_i32 = arith.constant 0 : i32
    %c0_i32_0 = arith.constant 0 : i32
    %c0_i32_1 = arith.constant 0 : i32
    return %arg0, %c0_i32, %c0_i32_0 : i32, i32, i32
  }
  func.func @transform_3(%arg0: i32) -> (i32, i32) {
    %c0_i32 = arith.constant 0 : i32
    %c0_i32_0 = arith.constant 0 : i32
    %c0_i32_1 = arith.constant 0 : i32
    return %c0_i32, %c0_i32_0 : i32, i32
  }
  func.func @transform_4(%arg0: i32) -> (i32, i32) {
    %c0_i32 = arith.constant 0 : i32
    %c0_i32_0 = arith.constant 0 : i32
    %c0_i32_1 = arith.constant 0 : i32
    return %c0_i32, %c0_i32_0 : i32, i32
  }
  func.func @transform_5(%arg0: i32) -> (i32, i32, i32) {
    %c0_i32 = arith.constant 0 : i32
    %c0_i32_0 = arith.constant 0 : i32
    %c0_i32_1 = arith.constant 0 : i32
    return %arg0, %c0_i32, %c0_i32_0 : i32, i32, i32
  }
}

</mosaic_0001>

<bundles_post_ra>
// kernel: tpu_custom_call.1
= control target key start
LH: loop header
LB: loop body
LE: loop exit
PB: predicated region body
PF: predicated region fallthrough
CT: control target
= control target key end

     0   :  { %7 = vsyncpa [#allocation3], 0  ;;  %s152_s0 = inlined_call_operand.hbm [shape: f32[8,128], index: 0, kind: input, shape index: {}]   ;;  %s153_s1 = inlined_call_operand.hbm [shape: f32[8,128], index: 1, kind: input, shape index: {}]   ;;  %s154_s2 = inlined_call_operand.hbm [shape: f32[8,128], index: 2, kind: output, shape index: {}]  }
   0x1   :  { %8 = vsyncpa [#allocation6], 0 }
   0x2   :  { %9 = vsyncpa [#allocation4], 0  ;;  %s125_s9 = smov [#allocation2]   ;;  %s126_s11 = smov [#allocation5]  }
   0x3   :  { %s16_s10 = sshll.u32 %s125_s9, 4  ;;  %s26_s12 = sshll.u32 %s126_s11, 4  ;;  %s17_s10 = int_to_ptr.vmem [resolvable:$true] %s16_s10  ;;  %s27_s12 = int_to_ptr.vmem [resolvable:$true] %s26_s12 }
   0x4   :  { %s67_s13 = scalar_lea.vmem %s17_s10, 128  ;;  %p72_p1 = scmp.lt.s32.totalorder %s17_s10, %s17_s10 }
   0x5   :  { %p68_p0 = scmp.ne.s32.totalorder %s17_s10, %s67_s13  ;;  %p73_p2 = scmp.lt.s32.totalorder %s67_s13, %s67_s13 }
   0x7   :  { %p74_p3 = por %p73_p2, %p72_p1 }
   0x9   :  { %p75_p4 = pnand %p74_p3, %p68_p0 }
   0xb   :  { %78 = shalt.err (!%p75_p4)
}
   0xc   :  { %19 = dma.hbm_to_vmem [thread:$0]  %s152_s0, 128, %s17_s10, [#allocation3]  }
   0xd   :  { %s87_s16 = scalar_lea.vmem %s27_s12, 128  ;;  %p92_p6 = scmp.lt.s32.totalorder %s27_s12, %s27_s12 }
   0xe   :  { %p88_p5 = scmp.ne.s32.totalorder %s27_s12, %s87_s16  ;;  %p93_p7 = scmp.lt.s32.totalorder %s87_s16, %s87_s16 }
  0x10   :  { %p94_p8 = por %p93_p7, %p92_p6 }
  0x12   :  { %p95_p9 = pnand %p94_p8, %p88_p5 }
  0x14   :  { %98 = shalt.err (!%p95_p9)
}
  0x15   :  { %29 = dma.hbm_to_vmem [thread:$0]  %s153_s1, 128, %s27_s12, [#allocation6]  }
  0x16   :  { %119 = dma.done.wait [#allocation3], 128  }
  0x17   :  { %120 = vsyncadd [#allocation3], 4294967168 }
  0x18   :  { %121 = dma.done.wait [#allocation6], 128  }
  0x19   :  { %122 = vsyncadd [#allocation6], 4294967168  ;;  %s127_s19 = smov [#allocation7]   ;;  %v36_v0 = vld [vmem:[#allocation2] sm:$0xff]  ;;  %v37_v1 = vld [vmem:[#allocation5] sm:$0xff] }
  0x1a   :  { %s46_s20 = sshll.u32 %s127_s19, 4  ;;  %v38_v2 = vadd.f32 %v37_v1, %v36_v0  ;;  %s47_s20 = int_to_ptr.vmem [resolvable:$true] %s46_s20 }
  0x1b   :  { %s99_s0 = scalar_lea.vmem %s47_s20, 128  ;;  %p104_p11 = scmp.lt.s32.totalorder %s47_s20, %s47_s20 }
  0x1c   :  { %39 = vst [vmem:[#allocation7] sm:$0xff] %v38_v2  ;;  %p100_p10 = scmp.ne.s32.totalorder %s47_s20, %s99_s0  ;;  %p105_p12 = scmp.lt.s32.totalorder %s99_s0, %s99_s0 }
  0x1e   :  { %p106_p13 = por %p105_p12, %p104_p11 }
  0x20   :  { %p107_p0 = pnand %p106_p13, %p100_p10 }
  0x22   :  { %110 = shalt.err (!%p107_p0)
}
  0x23   :  { %49 = dma.vmem_to_hbm [thread:$0]  %s47_s20, 128, %s154_s2, [#allocation4]  }
  0x24   :  { %123 = dma.done.wait [#allocation4], 128  }
  0x25   :  { %124 = vsyncadd [#allocation4], 4294967168 }
  0x26   :  { %53 = vsyncpa [#allocation3], 1 }
  0x27   :  { %54 = vsyncpa [#allocation6], 1 }
  0x28   :  { %55 = vsyncpa [#allocation4], 1 }

// kernel: tile.19
= control target key start
LH: loop header
LB: loop body
LE: loop exit
PB: predicated region body
PF: predicated region fallthrough
CT: control target
= control target key end

     0   :  { %vm8_vm0 = vcmask 64512   ;;  %s40_s8 = smov 8   ;;  %s41_s9 = smov 16   ;;  %vm14_vm1 = vcmask 261312   ;;  %vm20_vm2 = vcmask 195712   ;;  %vm26_vm3 = vcmask 130112   ;;  %s58_s0 = inlined_call_operand.vmem [shape: f32[4,8], index: 0, kind: input, shape index: {}]   ;;  %s59_s1 = inlined_call_operand.vmem [shape: f32[32], index: 1, kind: output, shape index: {}]  }
   0x1   :  { %v5_v0 = vld [vmem:[%s58_s0] sm:$0xf]  ;;  %s39_s0 = smov 24  }
   0x2   :  { %6 = vst [vmem:[#allocation1] sm:$0xf] %v5_v0 }
   0x9   :  { %v11_v1 = vld [vmem:[#allocation1 + $0x3] sm:$0x1]   ;;  %v23_v2 = vld [vmem:[#allocation1 + $0x1] sm:$0x1]   ;;  %v7_v3 = vld [vmem:[#allocation1] sm:$0x1]  }
   0xa   :  { %12 = vrot.lane.b32.xlu0 %v11_v1, %s39_s0  ;;  %24 = vrot.lane.b32.xlu1 %v23_v2, %s40_s8  ;;  %v17_v4 = vld [vmem:[#allocation1 + $0x2] sm:$0x1]   ;;  %9 = vst.msk [vmem:[#allocation0] sm:$0x1] %vm8_vm0, %v7_v3  }
   0xe   :  { %18 = vrot.lane.b32.xlu0 %v17_v4, %s41_s9 }
  0x7c   :  { %v13_v5 = vpop.permute.xlu0 %12   ;;  %v25_v6 = vpop.permute.xlu1 %24  }
  0x7d   :  { %15 = vst.msk [vmem:[#allocation0] sm:$0x1] %vm14_vm1, %v13_v5  }
  0x80   :  { %v19_v7 = vpop.permute.xlu0 %18  }
  0x81   :  { %21 = vst.msk [vmem:[#allocation0] sm:$0x1] %vm20_vm2, %v19_v7  }
  0x82   :  { %27 = vst.msk [vmem:[#allocation0] sm:$0x1] %vm26_vm3, %v25_v6  }
  0x89   :  { %v32_v8 = vld [vmem:[#allocation0] sm:$0x1] }
  0x8a   :  { %35 = vst [vmem:[%s59_s1] sm:$0x1] %v32_v8 }

// kernel: tile.18
= control target key start
LH: loop header
LB: loop body
LE: loop exit
PB: predicated region body
PF: predicated region fallthrough
CT: control target
= control target key end

     0   :  { %s22_s0 = inlined_call_operand.vmem [shape: f32[8], index: 0, kind: input, shape index: {}]   ;;  %s23_s1 = inlined_call_operand.vmem [shape: f32[4,8], index: 1, kind: output, shape index: {}]  }
   0x1   :  { %v4_v0 = vld [vmem:[%s22_s0] ss:$0 sm:$0xff] }
   0x2   :  { %5 = vst [vmem:[%s23_s1] sm:$0xf] %v4_v0 }

// kernel: _encoder_layer_impl.3
= control target key start
LH: loop header
LB: loop body
LE: loop exit
PB: predicated region body
PF: predicated region fallthrough
CT: control target
= control target key end

     0   :  { %s1266_s0 = inlined_call_operand.vmem [shape: f32[32,32], index: 0, kind: input, shape index: {}]   ;;  %s1267_s1 = inlined_call_operand.vmem [shape: f32[32,32], index: 1, kind: input, shape index: {}]   ;;  %s1268_s2 = inlined_call_operand.vmem [shape: f32[32,1], index: 2, kind: input, shape index: {}]   ;;  %s1269_s3 = inlined_call_operand.vmem [shape: f32[1,32], index: 3, kind: input, shape index: {}]   ;;  %s1270_s4 = inlined_call_operand.vmem [shape: f32[1,32], index: 4, kind: input, shape index: {}]   ;;  %s1271_s5 = inlined_call_operand.vmem [shape: f32[32,64], index: 5, kind: input, shape index: {}]   ;;  %s1272_s6 = inlined_call_operand.vmem [shape: f32[1,64], index: 6, kind: input, shape index: {}]   ;;  %s1273_s7 = inlined_call_operand.vmem [shape: f32[64,32], index: 7, kind: input, shape index: {}]   ;;  %s1274_s8 = inlined_call_operand.vmem [shape: f32[1,32], index: 8, kind: input, shape index: {}]   ;;  %s1275_s9 = inlined_call_operand.vmem [shape: f32[1,32], index: 9, kind: input, shape index: {}]   ;;  %s1276_s10 = inlined_call_operand.vmem [shape: f32[1,32], index: 10, kind: input, shape index: {}]   ;;  %s1277_s11 = inlined_call_operand.hbm [shape: f32[32,32], index: 11, kind: output, shape index: {}]  }
   0x1   :  { %1278 = sst [smem:[#allocation5_spill]] %s1266_s0 }
   0x2   :  { %16 = vsyncpa [#allocation3], 0 }
   0x3   :  { %18 = vsyncpa [#allocation3 + $0x1], 0  ;;  %s1088_s17 = smov 0   ;;  %s1090_s18 = smov 0  }
   0x4   :  { %s1092_s19 = smov 0   ;;  %s1094_s20 = smov 0  }
   0x5 LB: > { %s1109_s21 = sadd.s32 4294967295, %s1022_s20   ;;  %s837_s22 = sadd.s32 4294967294, %s1022_s20   ;;  %s1022_s20 = sphi %s1094_s20, %s1285_s20   ;;  %s1018_s19 = sphi %s1092_s19, %s1284_s19   ;;  %s1014_s18 = sphi %s1090_s18, %s1283_s18   ;;  %s1010_s17 = sphi %s1088_s17, %s1282_s17  }
   0x6   : > { %s1113_s23 = sadd.s32 1, %s1022_s20   ;;  %s277_s24 = sadd.s32 1, %s1018_s19 }
   0x7   : > { %s274_s25 = ssub.s32 %s1022_s20, %s1113_s23  ;;  %p287_p0 = scmp.ne.s32.totalorder %s1018_s19, %s1014_s18 }
   0x8   : > { %p275_p1 = scmp.eq.s32.totalorder %s274_s25, 0  ;;  %p288_p2 = scmp.eq.s32.totalorder %s1109_s21, 1 }
   0x9   : > { %p293_p3 = scmp.ne.s32.totalorder %s1014_s18, %s1010_s17  ;;  %p294_p4 = scmp.eq.s32.totalorder %s837_s22, 1 }
   0xa   : > { %s1124_s26 = scalar_select %p275_p1, %s1018_s19, %s277_s24  }
   0xb   : > { %p1126_p5 = por %p288_p2, %p287_p0  ;;  %p1130_p6 = por %p294_p4, %p293_p3 }
   0xc   : > { %p840_p7 = scmp.ge.s32.totalorder %s1022_s20, 1  ;;  %p363_p8 = scmp.lt.s32.totalorder %s1022_s20, 3 }
   0xe   : > { %p364_p9 = pnand %p840_p7, %p363_p8 }
   0xf   : > { %s842_s29 = sshll.u32 (!%p364_p9), %s1109_s21, 1  ;;  %s1281_s0 = sld [smem:[#allocation5_spill]] (!%p364_p9) }
  0x10   : > { %367 = sbr.rel (%p364_p9) target bundleno = 1067 (0x42b), region = 64  ;;  %p414_p10 = scmp.lt.s32.totalorder (!%p364_p9), %s842_s29, 3 }
  0x11   : > { %s410_s16 = sand.u32 (!%p364_p9), 1, %s1014_s18   ;;  %s863_s13 = sshll.u32 (!%p364_p9), %s1109_s21, 8 }
  0x12   : > { %s841_s25 = sshll.u32 (!%p364_p9), %s410_s16, 4  ;;  %s1221_s24 = scalar_lea.hbm (!%p364_p9), %s1277_s11, %s863_s13 }
  0x15   : > { %s1287_s29 = smov (!%p414_p10, %s842_s29), 3  ;;  %vm440_vm0 = vcmask 261120   ;;  %v487_v18 = vld [vmem:[%s1271_s5 + $0x18] sm:$0xff]  ;;  %v486_v19 = vld [vmem:[%s1271_s5 + $0x10] sm:$0xff]  ;;  %v485_v20 = vld [vmem:[%s1271_s5 + $0x8] sm:$0xff]  ;;  %v1024_v46 = vmov 0  }
  0x16   : > { %s1137_s30 = sshll.u32 %s1287_s29, 3  ;;  %880 = vmatprep.subr.mxu0 %v487_v18  ;;  %v484_v21 = vld [vmem:[%s1271_s5] sm:$0xff]  ;;  %v585_v22 = vld [vmem:[%s1273_s7 + $0x38] sm:$0xff]  ;;  %v584_v23 = vld [vmem:[%s1273_s7 + $0x30] sm:$0xff]  ;;  %953 = vset.pattern.permute.xlu1 %v1024_v46  ;;  %vm593_vm1 = vcmask 523264   ;;  %s1226_s29 = scalar_lea.sflag [#allocation3], %s410_s16 }
  0x17   : > { %s417_s14 = scalar_lea.vmem %s1281_s0, %s1137_s30  ;;  %s423_s22 = scalar_lea.vmem %s1267_s1, %s1137_s30  ;;  %881 = vmatpush3.msra.mxu0 %v487_v18  ;;  %891 = vmatprep.subr.mxu1 %v585_v22  ;;  %v583_v24 = vld [vmem:[%s1273_s7 + $0x28] sm:$0xff]  ;;  %v582_v25 = vld [vmem:[%s1273_s7 + $0x20] sm:$0xff]  ;;  %v581_v42 = vld [vmem:[%s1273_s7 + $0x18] sm:$0xff] }
  0x18   : > { %v432_v0 = vld [vmem:[%s417_s14] sm:$0xff]  ;;  %v433_v2 = vld [vmem:[%s417_s14 + $0x8] sm:$0xff]  ;;  %882 = vmatprep.subr.mxu0 %v486_v19  ;;  %892 = vmatpush3.msra.mxu1 %v585_v22  ;;  %v580_v43 = vld [vmem:[%s1273_s7 + $0x10] sm:$0xff]  ;;  %s429_s12 = scalar_lea.vmem %s1268_s2, %s1137_s30  ;;  %s412_s14 = scalar_lea.vmem [#allocation2], %s841_s25 }
  0x19   : > { %v434_v1 = vld [vmem:[%s423_s22] sm:$0xff]  ;;  %v435_v4 = vld [vmem:[%s423_s22 + $0x8] sm:$0xff]  ;;  %883 = vmatpush3.msra.mxu0 %v486_v19  ;;  %893 = vmatprep.subr.mxu1 %v584_v23  ;;  %s751_s30 = sshll.u32 %s412_s14, 4  ;;  %s1025_s25 = smov [#allocation2]   ;;  %s1223_s30 = int_to_ptr.vmem [resolvable:$true] %s751_s30 }
  0x1a   : > { %v436_v3 = vadd.f32 %v434_v1, %v432_v0  ;;  %v437_v5 = vadd.f32 %v435_v4, %v433_v2  ;;  %884 = vmatprep.subr.mxu0 %v485_v20  ;;  %894 = vmatpush3.msra.mxu1 %v584_v23  ;;  %v848_v33 = vld [vmem:[%s1269_s3] ss:$0 sm:$0xff]  ;;  %v579_v44 = vld [vmem:[%s1273_s7 + $0x8] sm:$0xff]  ;;  %s962_s21 = scalar_lea.vmem %s1223_s30, 256 }
  0x1b   : > { %885 = vmatpush3.msra.mxu0 %v485_v20  ;;  %895 = vmatprep.subr.mxu1 %v583_v24  ;;  %v849_v35 = vld [vmem:[%s1270_s4] ss:$0 sm:$0xff]  ;;  %v676_v47 = vld [vmem:[%s429_s12 + $0x8] sm:$0xff]  ;;  %p963_p11 = scmp.ne.s32.totalorder %s1223_s30, %s962_s21 }
  0x1c   : > { %v441_v6 = vsel %vm440_vm0, %v436_v3, 0.0  ;;  %v444_v7 = vsel %vm440_vm0, %v437_v5, 0.0  ;;  %886 = vmatprep.subr.mxu0 %v484_v21  ;;  %896 = vmatpush3.msra.mxu1 %v583_v24  ;;  %v578_v45 = vld [vmem:[%s1273_s7] sm:$0xff] }
  0x1d   : > { %442 = vadd.xlane.f32.xlu0 %v441_v6  ;;  %887 = vmatpush3.msra.mxu0 %v484_v21  ;;  %v675_v48 = vld [vmem:[%s429_s12] sm:$0xff]  ;;  %p964_p12 = pnand %p963_p11, %p1126_p5  ;;  %s966_s12 = sshll.u32 %s1025_s25, 4  ;;  %s967_s12 = int_to_ptr.vmem [resolvable:$false] %s966_s12 }
  0x1e   : > { %897 = vmatprep.subr.mxu1 %v582_v25  ;;  %952 = vset.pattern.permute.xlu0 %v1024_v46  ;;  %v850_v49 = vld [vmem:[%s1272_s6] ss:$0 sm:$0xff]  ;;  %s968_s13 = scalar_lea.vmem %s967_s12, 512  ;;  %p969_p0 = scmp.lt.s32.totalorder %s1223_s30, %s967_s12 }
  0x1f   : > { %898 = vmatpush3.msra.mxu1 %v582_v25  ;;  %v853_v56 = vld [vmem:[%s1274_s8] ss:$0 sm:$0xff]  ;;  %p965_p13 = pneg %p964_p12  ;;  %p970_p1 = scmp.lt.s32.totalorder %s968_s13, %s962_s21 }
  0x20   : > { %899 = vmatprep.subr.mxu1 %v581_v42  ;;  %v856_v22 = vld [vmem:[%s1275_s9] ss:$0 sm:$0xff] }
  0x21   : > { %445 = vadd.xlane.f32.xlu0 %v444_v7  ;;  %900 = vmatpush3.msra.mxu1 %v581_v42  ;;  %v857_v24 = vld [vmem:[%s1276_s10] ss:$0 sm:$0xff]  ;;  %p971_p2 = por %p970_p1, %p969_p0 }
  0x22   : > { %901 = vmatprep.subr.mxu1 %v580_v43 }
  0x23   : > { %902 = vmatpush3.msra.mxu1 %v580_v43  ;;  %p972_p3 = pnand %p971_p2, %p965_p13 }
  0x24   : > { %903 = vmatprep.subr.mxu1 %v579_v44 }
  0x25   : > { %904 = vmatpush3.msra.mxu1 %v579_v44 }
  0x26   : > { %905 = vmatprep.subr.mxu1 %v578_v45 }
  0x27   : > { %906 = vmatpush3.msra.mxu1 %v578_v45 }
  0x37   : > { %679 = vperm.xlu0 %952, %v675_v48  }
  0xa6   : > { %v443_v8 = vpop.xlane.xlu0 %442 }
  0xa7   : > { %v448_v9 = vmul.f32 0.03125, %v443_v8 }
  0xa9   : > { %v450_v10 = vsub.f32 %v436_v3, %v448_v9 }
  0xaa   : > { %v446_v11 = vpop.xlane.xlu0 %445 }
  0xab   : > { %v449_v12 = vmul.f32 0.03125, %v446_v11  ;;  %v452_v13 = vmul.f32 %v450_v10, %v450_v10 }
  0xad   : > { %v451_v14 = vsub.f32 %v437_v5, %v449_v12  ;;  %v454_v15 = vsel %vm440_vm0, %v452_v13, 0.0 }
  0xae   : > { %455 = vadd.xlane.f32.xlu1 %v454_v15 }
  0xaf   : > { %v453_v16 = vmul.f32 %v451_v14, %v451_v14 }
  0xb1   : > { %v457_v17 = vsel %vm440_vm0, %v453_v16, 0.0 }
  0xb2   : > { %458 = vadd.xlane.f32.xlu1 %v457_v17  ;;  %v680_v61 = vpop.permute.xlu0 %679 }
  0xc3   : > { %684 = vperm.xlu1 %953, %v676_v47  }
 0x137   : > { %v456_v26 = vpop.xlane.xlu1 %455 }
 0x138   : > { %v460_v27 = vmul.f32 0.03125, %v456_v26 }
 0x13a   : > { %v462_v28 = vadd.f32 1e-05, %v460_v27 }
 0x13b   : > { %v459_v29 = vpop.xlane.xlu1 %458 }
 0x13c   : > { %954 = vrsqrt.f32 %v462_v28  ;;  %v461_v30 = vmul.f32 0.03125, %v459_v29 }
 0x13e   : > { %v463_v31 = vadd.f32 1e-05, %v461_v30 }
 0x13f   : > { %v685_v58 = vpop.permute.xlu1 %684 }
 0x140   : > { %956 = vrsqrt.f32 %v463_v31 }
 0x149   : > { %v955_v32 = vpop.eup %954 }
 0x14a   : > { %v466_v34 = vmul.f32 %v955_v32, %v450_v10 }
 0x14c   : > { %v474_v36 = vmul.f32 %v848_v33, %v466_v34 }
 0x14d   : > { %v957_v37 = vpop.eup %956 }
 0x14e   : > { %v467_v38 = vmul.f32 %v957_v37, %v451_v14  ;;  %v482_v39 = vadd.f32 %v849_v35, %v474_v36 }
 0x150   : > { %v475_v40 = vmul.f32 %v848_v33, %v467_v38  ;;  %888 = vmatprep.mubr.msk.f32.mxu0 %vm440_vm0, %v482_v39 }
 0x152   : > { %v483_v41 = vadd.f32 %v849_v35, %v475_v40 }
 0x154   : > { %889 = vmatmul.mubr.msk.f32.vlgmr.msra.gmra.mxu0 %vm440_vm0, %v483_v41 }
 0x214   : > { %v890_v50 = vpop.f32.mrf.mxu0 }
 0x215   : > { %v573_v51 = vadd.f32 %v890_v50, %v850_v49 }
 0x216   : > { %v567_v52 = vpop.f32.mrf.mxu0 }
 0x217   : > { %v568_v53 = vadd.f32 %v850_v49, %v567_v52  ;;  %v577_v55 = vmax.f32 %v573_v51, 0.0 }
 0x219   : > { %v576_v54 = vmax.f32 %v568_v53, 0.0 }
 0x21b   : > { %907 = vmatprep.mubr.msk.f32.mxu1 %vm593_vm1, %v576_v54 }
 0x21c   : > { %908 = vmatmul.mubr.msk.f32.vlgmr.msra.gmra.mxu1 %vm593_vm1, %v577_v55 }
 0x2dc   : > { %v909_v57 = vpop.f32.mrf.mxu1 }
 0x2dd   : > { %v672_v59 = vadd.f32 %v909_v57, %v853_v56 }
 0x2de   : > { %v666_v60 = vpop.f32.mrf.mxu1 }
 0x2df   : > { %v667_v62 = vadd.f32 %v853_v56, %v666_v60  ;;  %v688_v63 = vmul.f32 %v685_v58, %v672_v59 }
 0x2e1   : > { %v687_v0 = vmul.f32 %v680_v61, %v667_v62  ;;  %v690_v1 = vadd.f32 %v688_v63, %v483_v41 }
 0x2e3   : > { %v696_v2 = vsel %vm440_vm0, %v690_v1, 0.0  ;;  %v689_v3 = vadd.f32 %v687_v0, %v482_v39 }
 0x2e4   : > { %697 = vadd.xlane.f32.xlu0 %v696_v2 }
 0x2e5   : > { %v693_v4 = vsel %vm440_vm0, %v689_v3, 0.0 }
 0x2e6   : > { %694 = vadd.xlane.f32.xlu1 %v693_v4 }
 0x36d   : > { %v698_v5 = vpop.xlane.xlu0 %697 }
 0x36e   : > { %v700_v6 = vmul.f32 0.03125, %v698_v5 }
 0x36f   : > { %v695_v7 = vpop.xlane.xlu1 %694 }
 0x370   : > { %v699_v8 = vmul.f32 0.03125, %v695_v7  ;;  %v702_v9 = vsub.f32 %v690_v1, %v700_v6 }
 0x372   : > { %v701_v10 = vsub.f32 %v689_v3, %v699_v8  ;;  %v704_v13 = vmul.f32 %v702_v9, %v702_v9 }
 0x374   : > { %v703_v11 = vmul.f32 %v701_v10, %v701_v10  ;;  %v708_v14 = vsel %vm440_vm0, %v704_v13, 0.0 }
 0x376   : > { %v705_v12 = vsel %vm440_vm0, %v703_v11, 0.0 }
 0x377   : > { %706 = vadd.xlane.f32.xlu1 %v705_v12 }
 0x37b   : > { %709 = vadd.xlane.f32.xlu1 %v708_v14 }
 0x400   : > { %v707_v15 = vpop.xlane.xlu1 %706 }
 0x401   : > { %v711_v16 = vmul.f32 0.03125, %v707_v15 }
 0x403   : > { %v713_v17 = vadd.f32 1e-05, %v711_v16 }
 0x404   : > { %v710_v18 = vpop.xlane.xlu1 %709 }
 0x405   : > { %958 = vrsqrt.f32 %v713_v17  ;;  %v712_v19 = vmul.f32 0.03125, %v710_v18 }
 0x407   : > { %v714_v20 = vadd.f32 1e-05, %v712_v19 }
 0x409   : > { %960 = vrsqrt.f32 %v714_v20 }
 0x412   : > { %v959_v21 = vpop.eup %958 }
 0x413   : > { %v717_v23 = vmul.f32 %v959_v21, %v701_v10 }
 0x415   : > { %v725_v25 = vmul.f32 %v856_v22, %v717_v23 }
 0x416   : > { %v961_v26 = vpop.eup %960 }
 0x417   : > { %v718_v27 = vmul.f32 %v961_v26, %v702_v9  ;;  %v733_v28 = vadd.f32 %v857_v24, %v725_v25 }
 0x419   : > { %v726_v29 = vmul.f32 %v856_v22, %v718_v27  ;;  %735 = vst.msk [vmem:[%s412_s14] sm:$0xff] %vm440_vm0, %v733_v28 }
 0x41b   : > { %v734_v30 = vadd.f32 %v857_v24, %v726_v29 }
 0x41d   : > { %736 = vst.msk [vmem:[%s412_s14 + $0x8] sm:$0xff] %vm440_vm0, %v734_v30 }
 0x41e   : > { %975 = shalt.err (!%p972_p3)
}
 0x41f   : > { %s976_s16 = scalar_lea.hbm %s1221_s24, 256  ;;  %s980_s22 = scalar_lea.hbm %s1277_s11, 512 }
 0x420   : > { %p977_p4 = scmp.ne.s32.totalorder %s1221_s24, %s976_s16  ;;  %p981_p9 = scmp.lt.s32.totalorder %s1221_s24, %s1277_s11 }
 0x421   : > { %p982_p10 = scmp.lt.s32.totalorder %s980_s22, %s976_s16 }
 0x422   : > { %p978_p7 = pnand %p977_p4, %p1126_p5 }
 0x423   : > { %p983_p11 = por %p982_p10, %p981_p9 }
 0x424   : > { %p979_p8 = pneg %p978_p7 }
 0x426   : > { %p984_p12 = pnand %p983_p11, %p979_p8 }
 0x428   : > { %987 = shalt.err (!%p984_p12)
}
 0x429   : > { %s1026_s21 = smov 128   ;;  %s1027_s12 = smov 8  }
 0x42a   : > { %910 = dma.vmem_to_hbm [thread:$0]  (%p1126_p5), %s1223_s30, 256, %s1221_s24, %s1226_s29, %s1026_s21, %s1026_s21, %s1027_s12  }
 0x42b PF: > { %p916_p13 = scmp.ge.s32.totalorder %s1022_s20, 2  ;;  %s766_s13 = sand.u32 1, %s1010_s17  }
 0x42c   : > { %s767_s0 = scalar_lea.sflag [#allocation3], %s766_s13 }
 0x42d   : > { %p913_p0 = pnand %p916_p13, %p1130_p6 }
 0x42f   : > { %p914_p1 = pneg %p913_p0 }
 0x431   : > { %1005 = dma.done.wait (%p914_p1), %s767_s0, 256  }
 0x432   : > { %1007 = vsyncadd (%p914_p1), %s767_s0, 4294967040  ;;  %p21_p2 = scmp.ge.s32.totalorder %s1113_s23, 4   ;;  %s1282_s17 = smov %s1014_s18 }
 0x433   : > { %s1283_s18 = smov %s1018_s19  ;;  %s1284_s19 = smov %s1124_s26 }
 0x434   : > { %s1285_s20 = smov %s1113_s23  ;;  %23 = sbr.rel (!%p21_p2) target bundleno = 5 (0x5), region = 105 }
 0x439   :  { %772 = vsyncpa [#allocation3], 1 }
 0x43a   :  { %774 = vsyncpa [#allocation3 + $0x1], 1 }

// kernel: _encoder_layer_impl.2
= control target key start
LH: loop header
LB: loop body
LE: loop exit
PB: predicated region body
PF: predicated region fallthrough
CT: control target
= control target key end

     0   :  { %s1561_s18 = smov 0   ;;  %s1732_s0 = inlined_call_operand.vmem [shape: f32[2,16,32], index: 0, kind: input, shape index: {}]   ;;  %s1733_s1 = inlined_call_operand.vmem [shape: f32[2,16,1], index: 1, kind: input, shape index: {}]   ;;  %s1734_s2 = inlined_call_operand.vmem [shape: f32[2,1,16], index: 2, kind: input, shape index: {}]   ;;  %s1735_s3 = inlined_call_operand.vmem [shape: f32[32,96], index: 3, kind: input, shape index: {}]   ;;  %s1736_s4 = inlined_call_operand.vmem [shape: f32[1,96], index: 4, kind: input, shape index: {}]   ;;  %s1737_s5 = inlined_call_operand.vmem [shape: f32[2,16,32], index: 5, kind: output, shape index: {}]  }
   0x1 LB: > { %s1302_s19 = sadd.s32 4294967295, %s1514_s18   ;;  %p1306_p0 = scmp.ge.s32.totalorder %s1514_s18, 1  ;;  %s1514_s18 = sphi %s1561_s18, %s15_s18  }
   0x2   : > { %p205_p1 = scmp.lt.s32.totalorder %s1514_s18, 3 }
   0x4   : > { %p206_p2 = pnand %p1306_p0, %p205_p1 }
   0x5   : > { %p241_p3 = scmp.lt.s32.totalorder (!%p206_p2), %s1302_s19, 1  ;;  %s1516_s9 = smov (!%p206_p2), 88  }
   0x6   : > { %209 = sbr.rel (%p206_p2) target bundleno = 2206 (0x89e), region = 40  ;;  %s1517_s10 = smov (!%p206_p2), 96  }
   0x7   : > { %s1519_s14 = smov (!%p206_p2), 120   ;;  %s1521_s20 = smov (!%p206_p2), 56  }
   0x8   : > { %s1522_s21 = smov (!%p206_p2), 80   ;;  %s1523_s22 = smov (!%p206_p2), 112  }
   0x9   : > { %s1524_s23 = smov (!%p206_p2), 48   ;;  %s1525_s24 = smov (!%p206_p2), 72  }
   0xa   : > { %s1526_s25 = smov (!%p206_p2), 104   ;;  %s1527_s26 = smov (!%p206_p2), 40  }
   0xb   : > { %v267_v0 = vld [vmem:[%s1735_s3 + $0x18] sm:$0xff]  ;;  %v266_v1 = vld [vmem:[%s1735_s3 + $0x10] sm:$0xff]  ;;  %v265_v2 = vld [vmem:[%s1735_s3 + $0x8] sm:$0xff]  ;;  %s1739_s19 = smov (!%p241_p3, %s1302_s19), 1  ;;  %vm275_vm0 = vcmask 261120   ;;  %vm387_vm1 = vcmask 64512  }
   0xc   : > { %1384 = vmatprep.subr.mxu0 %v267_v0  ;;  %v264_v3 = vld [vmem:[%s1735_s3] sm:$0xff]  ;;  %s1584_s28 = sshll.u32 %s1739_s19, 4  ;;  %v1518_v12 = vmov 0   ;;  %s253_s17 = scalar_lea.vmem %s1734_s2, %s1739_s19  ;;  %vm475_vm2 = vcmask 130048   ;;  %vm1219_vm3 = vcmask 195584  }
   0xd   : > { %1385 = vmatpush3.msra.mxu0 %v267_v0  ;;  %s245_s6 = scalar_lea.vmem %s1732_s0, %s1584_s28  ;;  %v1313_v6 = vld [vmem:[%s1736_s4] ss:$0 sm:$0xff]  ;;  %1475 = vset.pattern.permute.xlu1 %v1518_v12  ;;  %s250_s13 = scalar_lea.vmem %s1733_s1, %s1584_s28 }
   0xe   : > { %1386 = vmatprep.subr.mxu0 %v266_v1  ;;  %v259_v4 = vld [vmem:[%s245_s6] sm:$0xff]  ;;  %v260_v5 = vld [vmem:[%s245_s6 + $0x8] sm:$0xff]  ;;  %1474 = vset.pattern.permute.xlu0 %v1518_v12  ;;  %s1520_s19 = smov 64   ;;  %s1528_s27 = smov 8  }
   0xf   : > { %1387 = vmatpush3.msra.mxu0 %v266_v1  ;;  %1392 = vmatprep.mubr.msk.f32.mxu0 %vm275_vm0, %v259_v4  ;;  %v262_v14 = vld [vmem:[%s250_s13 + $0x8] sm:$0xff]  ;;  %v261_v15 = vld [vmem:[%s250_s13] sm:$0xff]  ;;  %s1529_s29 = smov 16   ;;  %s1530_s30 = smov 24  }
  0x10   : > { %1388 = vmatprep.subr.mxu0 %v265_v2  ;;  %v1316_v22 = vld [vmem:[%s253_s17] ss:$0 sm:$0xff]  ;;  %s258_s8 = scalar_lea.vmem %s1737_s5, %s1584_s28 }
  0x11   : > { %1389 = vmatpush3.msra.mxu0 %v265_v2 }
  0x12   : > { %1390 = vmatprep.subr.mxu0 %v264_v3 }
  0x13   : > { %1391 = vmatpush3.msra.mxu0 %v264_v3 }
  0x14   : > { %1393 = vmatmul.mubr.msk.f32.vlgmr.msra.gmra.mxu0 %vm275_vm0, %v260_v5 }
  0xd4   : > { %v1394_v7 = vpop.f32.mrf.mxu0 }
  0xd5   : > { %v1595_v8 = vadd.f32 %v1394_v7, %v1313_v6 }
  0xd6   : > { %v348_v9 = vpop.f32.mrf.mxu0 }
  0xd7   : > { %v1597_v10 = vadd.f32 %v1313_v6, %v348_v9  ;;  %591 = vrot.lane.b32.xlu1 %v1595_v8, %s1516_s9  ;;  %385 = vrot.lane.b32.xlu0 %v1595_v8, %s1517_s10  ;;  %v1609_v13 = vmul.f32 0.35355338, %v1595_v8 }
  0xd9   : > { %v1602_v11 = vmul.f32 0.35355338, %v1597_v10 }
  0xdb   : > { %589 = vrot.lane.b32.xlu1 %v1597_v10, %s1516_s9  ;;  %383 = vrot.lane.b32.xlu0 %v1597_v10, %s1517_s10 }
  0xdc   : > { %1399 = vmatprep.mubr.msk.f32.mxu1 %vm387_vm1, %v1602_v11 }
  0xdf   : > { %587 = vrot.lane.b32.xlu1 %v1609_v13, %s1519_s14  ;;  %585 = vrot.lane.b32.xlu0 %v1602_v11, %s1519_s14 }
  0xe3   : > { %364 = vperm.xlu1 %1475, %v262_v14   ;;  %359 = vperm.xlu0 %1474, %v261_v15  }
 0x149   : > { %v386_v16 = vpop.permute.xlu0 %385  ;;  %v592_v17 = vpop.permute.xlu1 %591 }
 0x14a   : > { %1395 = vmatprep.subr.msk.mxu1 %vm387_vm1, %v386_v16 }
 0x14b   : > { %1396 = vmatpush3.xpose.msk.msra.mxu1 %vm387_vm1, %v386_v16 }
 0x14d   : > { %v384_v18 = vpop.permute.xlu0 %383  ;;  %v590_v20 = vpop.permute.xlu1 %589 }
 0x14e   : > { %1397 = vmatprep.subr.msk.mxu1 %vm387_vm1, %v384_v18 }
 0x14f   : > { %1398 = vmatpush3.xpose.msk.msra.mxu1 %vm387_vm1, %v384_v18 }
 0x150   : > { %1409 = vmatprep.subr.msk.mxu1 %vm387_vm1, %v592_v17 }
 0x151   : > { %v586_v19 = vpop.permute.xlu0 %585  ;;  %v588_v21 = vpop.permute.xlu1 %587 }
 0x152   : > { %1400 = vmatmul.mubr.msk.f32.vlgmr.msra.gmra.mxu1 %vm387_vm1, %v1609_v13 }
 0x153   : > { %1410 = vmatpush3.xpose.msk.msra.mxu1 %vm387_vm1, %v592_v17  ;;  %1413 = vmatprep.mubr.msk.f32.mxu1 %vm387_vm1, %v586_v19 }
 0x154   : > { %1411 = vmatprep.subr.msk.mxu1 %vm387_vm1, %v590_v20 }
 0x157   : > { %1412 = vmatpush3.xpose.msk.msra.mxu1 %vm387_vm1, %v590_v20 }
 0x15a   : > { %1414 = vmatmul.mubr.msk.f32.vlgmr.msra.gmra.mxu1 %vm387_vm1, %v588_v21 }
 0x15e   : > { %v1633_v23 = vpop.permute.xlu1 %364  ;;  %v1635_v24 = vpop.permute.xlu0 %359 }
 0x15f   : > { %v374_v25 = vmul.f32 %v1316_v22, %v1633_v23  ;;  %v373_v26 = vmul.f32 %v1316_v22, %v1635_v24 }
 0x161   : > { %v376_v27 = vsub.f32 1.0, %v374_v25  ;;  %v375_v28 = vsub.f32 1.0, %v373_v26 }
 0x163   : > { %v1639_v29 = vmul.f32 35355.34, %v376_v27  ;;  %v1641_v30 = vmul.f32 35355.34, %v375_v28 }
 0x212   : > { %v1401_v31 = vpop.f32.mrf.mxu1 }
 0x213   : > { %v474_v32 = vsub.f32 %v1401_v31, %v1639_v29 }
 0x214   : > { %v464_v33 = vpop.f32.mrf.mxu1 }
 0x215   : > { %v473_v34 = vsub.f32 %v464_v33, %v1641_v30  ;;  %v479_v35 = vsel %vm475_vm2, %v474_v32, -inf }
 0x216   : > { %480 = vmax.xlane.f32.xlu0 %v479_v35 }
 0x217   : > { %v476_v36 = vsel %vm475_vm2, %v473_v34, -inf }
 0x218   : > { %477 = vmax.xlane.f32.xlu1 %v476_v36 }
 0x21a   : > { %v1415_v37 = vpop.f32.mrf.mxu1 }
 0x21b   : > { %v677_v38 = vsub.f32 %v1415_v37, %v1639_v29 }
 0x21c   : > { %v667_v39 = vpop.f32.mrf.mxu1 }
 0x21d   : > { %v676_v40 = vsub.f32 %v667_v39, %v1641_v30  ;;  %v681_v41 = vsel %vm475_vm2, %v677_v38, -inf }
 0x21e   : > { %682 = vmax.xlane.f32.xlu1 %v681_v41 }
 0x21f   : > { %v678_v42 = vsel %vm475_vm2, %v676_v40, -inf }
 0x220   : > { %679 = vmax.xlane.f32.xlu0 %v678_v42 }
 0x22f   : > { %498 = vrot.lane.b32.xlu1 %v1597_v10, %s1520_s19 }
 0x233   : > { %702 = vrot.lane.b32.xlu1 %v1595_v8, %s1521_s20 }
 0x236   : > { %500 = vrot.lane.b32.xlu0 %v1595_v8, %s1520_s19 }
 0x29f   : > { %v481_v43 = vpop.xlane.xlu0 %480 }
 0x2a0   : > { %v483_v44 = vsub.f32 %v474_v32, %v481_v43 }
 0x2a1   : > { %v478_v45 = vpop.xlane.xlu1 %477 }
 0x2a2   : > { %v486_v46 = vmul.f32 1.442695, %v483_v44  ;;  %v482_v47 = vsub.f32 %v473_v34, %v478_v45 }
 0x2a4   : > { %1476 = vpow2.f32 %v486_v46  ;;  %v484_v48 = vmul.f32 1.442695, %v482_v47 }
 0x2a6   : > { %1478 = vpow2.f32 %v484_v48 }
 0x2a7   : > { %v683_v49 = vpop.xlane.xlu1 %682 }
 0x2a8   : > { %v685_v50 = vsub.f32 %v677_v38, %v683_v49 }
 0x2a9   : > { %v680_v51 = vpop.xlane.xlu0 %679 }
 0x2aa   : > { %v688_v52 = vmul.f32 1.442695, %v685_v50  ;;  %v684_v53 = vsub.f32 %v676_v40, %v680_v51 }
 0x2ab   : > { %v499_v54 = vpop.permute.xlu1 %498 }
 0x2ac   : > { %1480 = vpow2.f32 %v688_v52  ;;  %v686_v55 = vmul.f32 1.442695, %v684_v53 }
 0x2ad   : > { %v501_v56 = vpop.permute.xlu0 %500 }
 0x2ae   : > { %1482 = vpow2.f32 %v686_v55  ;;  %1402 = vmatprep.subr.mxu0 %v501_v56 }
 0x2af   : > { %1403 = vmatpush3.msra.mxu0 %v501_v56  ;;  %v703_v58 = vpop.permute.xlu1 %702 }
 0x2b0   : > { %1404 = vmatprep.subr.mxu0 %v499_v54 }
 0x2b1   : > { %v1477_v57 = vpop.eup %1476  ;;  %1405 = vmatpush3.msra.mxu0 %v499_v54 }
 0x2b2   : > { %1416 = vmatprep.subr.mxu0 %v703_v58  ;;  %v491_v59 = vsel %vm475_vm2, %v1477_v57, 0.0 }
 0x2b3   : > { %v1479_v60 = vpop.eup %1478  ;;  %492 = vadd.xlane.f32.xlu1 %v491_v59 }
 0x2b4   : > { %v488_v61 = vsel %vm475_vm2, %v1479_v60, 0.0 }
 0x2b5   : > { %489 = vadd.xlane.f32.xlu0 %v488_v61 }
 0x2b9   : > { %v1481_v62 = vpop.eup %1480 }
 0x2ba   : > { %v693_v63 = vsel %vm475_vm2, %v1481_v62, 0.0 }
 0x2bb   : > { %v1483_v0 = vpop.eup %1482  ;;  %694 = vadd.xlane.f32.xlu1 %v693_v63 }
 0x2bc   : > { %v690_v1 = vsel %vm475_vm2, %v1483_v0, 0.0 }
 0x2bd   : > { %691 = vadd.xlane.f32.xlu0 %v690_v1 }
 0x2cc   : > { %793 = vrot.lane.b32.xlu1 %v1595_v8, %s1522_s21 }
 0x2d0   : > { %787 = vrot.lane.b32.xlu1 %v1602_v11, %s1523_s22 }
 0x2d3   : > { %700 = vrot.lane.b32.xlu0 %v1597_v10, %s1521_s20 }
 0x2d7   : > { %791 = vrot.lane.b32.xlu0 %v1597_v10, %s1522_s21 }
 0x2db   : > { %789 = vrot.lane.b32.xlu0 %v1609_v13, %s1523_s22 }
 0x33c   : > { %v493_v2 = vpop.xlane.xlu1 %492 }
 0x33d   : > { %1484 = vrcp.f32 %v493_v2 }
 0x33e   : > { %v490_v3 = vpop.xlane.xlu0 %489 }
 0x33f   : > { %1486 = vrcp.f32 %v490_v3 }
 0x344   : > { %v695_v4 = vpop.xlane.xlu1 %694 }
 0x345   : > { %1488 = vrcp.f32 %v695_v4 }
 0x346   : > { %v692_v5 = vpop.xlane.xlu0 %691 }
 0x347   : > { %1490 = vrcp.f32 %v692_v5 }
 0x348   : > { %v794_v15 = vpop.permute.xlu1 %793 }
 0x34a   : > { %v1485_v6 = vpop.eup %1484  ;;  %v701_v14 = vpop.permute.xlu0 %700 }
 0x34b   : > { %v497_v12 = vmul.f32 %v1485_v6, %v1477_v57 }
 0x34c   : > { %v1487_v7 = vpop.eup %1486  ;;  %v788_v20 = vpop.permute.xlu1 %787 }
 0x34d   : > { %v496_v9 = vmul.f32 %v1487_v7, %v1479_v60 }
 0x34e   : > { %v792_v21 = vpop.permute.xlu0 %791 }
 0x34f   : > { %1406 = vmatprep.mubr.msk.f32.mxu0 %vm475_vm2, %v496_v9 }
 0x350   : > { %1407 = vmatmul.mubr.msk.f32.vlgmr.msra.gmra.mxu0 %vm475_vm2, %v497_v12 }
 0x351   : > { %1417 = vmatpush3.msra.mxu0 %v703_v58 }
 0x352   : > { %1418 = vmatprep.subr.mxu0 %v701_v14  ;;  %v1489_v16 = vpop.eup %1488  ;;  %v790_v22 = vpop.permute.xlu0 %789 }
 0x353   : > { %1419 = vmatpush3.msra.mxu0 %v701_v14  ;;  %v699_v19 = vmul.f32 %v1489_v16, %v1481_v62 }
 0x354   : > { %v1491_v17 = vpop.eup %1490  ;;  %1423 = vmatprep.subr.msk.mxu0 %vm387_vm1, %v794_v15 }
 0x355   : > { %v698_v18 = vmul.f32 %v1491_v17, %v1483_v0 }
 0x357   : > { %1420 = vmatprep.mubr.msk.f32.mxu0 %vm475_vm2, %v698_v18 }
 0x358   : > { %1421 = vmatmul.mubr.msk.f32.vlgmr.msra.gmra.mxu0 %vm475_vm2, %v699_v19 }
 0x359   : > { %1424 = vmatpush3.xpose.msk.msra.mxu0 %vm387_vm1, %v794_v15  ;;  %1427 = vmatprep.mubr.msk.f32.mxu0 %vm387_vm1, %v788_v20 }
 0x35a   : > { %1425 = vmatprep.subr.msk.mxu0 %vm387_vm1, %v792_v21 }
 0x35d   : > { %1426 = vmatpush3.xpose.msk.msra.mxu0 %vm387_vm1, %v792_v21 }
 0x360   : > { %1428 = vmatmul.mubr.msk.f32.vlgmr.msra.gmra.mxu0 %vm387_vm1, %v790_v22 }
 0x410   : > { %v1675_v25 = vpop.f32.mrf.mxu0 }
 0x412   : > { %v1677_v26 = vpop.f32.mrf.mxu0 }
 0x418   : > { %v1679_v27 = vpop.f32.mrf.mxu0 }
 0x41a   : > { %v1681_v28 = vpop.f32.mrf.mxu0 }
 0x420   : > { %v1429_v31 = vpop.f32.mrf.mxu0 }
 0x421   : > { %v879_v32 = vsub.f32 %v1429_v31, %v1639_v29 }
 0x422   : > { %v869_v33 = vpop.f32.mrf.mxu0 }
 0x423   : > { %v878_v34 = vsub.f32 %v869_v33, %v1641_v30  ;;  %v883_v35 = vsel %vm475_vm2, %v879_v32, -inf }
 0x424   : > { %884 = vmax.xlane.f32.xlu0 %v883_v35 }
 0x425   : > { %v880_v36 = vsel %vm475_vm2, %v878_v34, -inf }
 0x426   : > { %881 = vmax.xlane.f32.xlu1 %v880_v36 }
 0x4ad   : > { %v885_v37 = vpop.xlane.xlu0 %884 }
 0x4ae   : > { %v887_v38 = vsub.f32 %v879_v32, %v885_v37 }
 0x4af   : > { %v882_v39 = vpop.xlane.xlu1 %881 }
 0x4b0   : > { %v890_v40 = vmul.f32 1.442695, %v887_v38  ;;  %v886_v41 = vsub.f32 %v878_v34, %v882_v39 }
 0x4b2   : > { %1492 = vpow2.f32 %v890_v40  ;;  %v888_v42 = vmul.f32 1.442695, %v886_v41 }
 0x4b4   : > { %1494 = vpow2.f32 %v888_v42 }
 0x4bf   : > { %v1493_v43 = vpop.eup %1492 }
 0x4c0   : > { %v895_v44 = vsel %vm475_vm2, %v1493_v43, 0.0 }
 0x4c1   : > { %v1495_v45 = vpop.eup %1494  ;;  %896 = vadd.xlane.f32.xlu1 %v895_v44 }
 0x4c2   : > { %v892_v46 = vsel %vm475_vm2, %v1495_v45, 0.0 }
 0x4c3   : > { %893 = vadd.xlane.f32.xlu0 %v892_v46 }
 0x4d2   : > { %902 = vrot.lane.b32.xlu1 %v1597_v10, %s1524_s23 }
 0x4d6   : > { %995 = vrot.lane.b32.xlu1 %v1595_v8, %s1525_s24 }
 0x4d9   : > { %904 = vrot.lane.b32.xlu0 %v1595_v8, %s1524_s23 }
 0x4da   : > { %989 = vrot.lane.b32.xlu1 %v1602_v11, %s1526_s25 }
 0x4dd   : > { %993 = vrot.lane.b32.xlu0 %v1597_v10, %s1525_s24 }
 0x4e1   : > { %991 = vrot.lane.b32.xlu0 %v1609_v13, %s1526_s25 }
 0x54a   : > { %v897_v47 = vpop.xlane.xlu1 %896 }
 0x54b   : > { %1496 = vrcp.f32 %v897_v47 }
 0x54c   : > { %v894_v48 = vpop.xlane.xlu0 %893 }
 0x54d   : > { %1498 = vrcp.f32 %v894_v48 }
 0x54e   : > { %v903_v49 = vpop.permute.xlu1 %902 }
 0x550   : > { %v905_v50 = vpop.permute.xlu0 %904 }
 0x551   : > { %1430 = vmatprep.subr.mxu1 %v905_v50 }
 0x552   : > { %1431 = vmatpush3.msra.mxu1 %v905_v50  ;;  %v996_v51 = vpop.permute.xlu1 %995 }
 0x553   : > { %1432 = vmatprep.subr.mxu1 %v903_v49 }
 0x554   : > { %1433 = vmatpush3.msra.mxu1 %v903_v49  ;;  %v994_v55 = vpop.permute.xlu0 %993 }
 0x555   : > { %1437 = vmatprep.subr.msk.mxu1 %vm387_vm1, %v996_v51 }
 0x556   : > { %v990_v13 = vpop.permute.xlu1 %989 }
 0x558   : > { %v1497_v52 = vpop.eup %1496  ;;  %v992_v56 = vpop.permute.xlu0 %991 }
 0x559   : > { %v901_v54 = vmul.f32 %v1497_v52, %v1493_v43 }
 0x55a   : > { %v1499_v53 = vpop.eup %1498 }
 0x55b   : > { %v900_v11 = vmul.f32 %v1499_v53, %v1495_v45 }
 0x55d   : > { %1434 = vmatprep.mubr.msk.f32.mxu1 %vm475_vm2, %v900_v11 }
 0x55e   : > { %1435 = vmatmul.mubr.msk.f32.vlgmr.msra.gmra.mxu1 %vm475_vm2, %v901_v54 }
 0x55f   : > { %1438 = vmatpush3.xpose.msk.msra.mxu1 %vm387_vm1, %v996_v51  ;;  %1441 = vmatprep.mubr.msk.f32.mxu1 %vm387_vm1, %v990_v13 }
 0x560   : > { %1439 = vmatprep.subr.msk.mxu1 %vm387_vm1, %v994_v55 }
 0x563   : > { %1440 = vmatpush3.xpose.msk.msra.mxu1 %vm387_vm1, %v994_v55 }
 0x566   : > { %1442 = vmatmul.mubr.msk.f32.vlgmr.msra.gmra.mxu1 %vm387_vm1, %v992_v56 }
 0x61e   : > { %v1436_v57 = vpop.f32.mrf.mxu1 }
 0x620   : > { %v980_v58 = vpop.f32.mrf.mxu1 }
 0x626   : > { %v1443_v59 = vpop.f32.mrf.mxu1 }
 0x627   : > { %v1081_v60 = vsub.f32 %v1443_v59, %v1639_v29 }
 0x628   : > { %v1071_v61 = vpop.f32.mrf.mxu1 }
 0x629   : > { %v1080_v62 = vsub.f32 %v1071_v61, %v1641_v30  ;;  %v1085_v63 = vsel %vm475_vm2, %v1081_v60, -inf }
 0x62a   : > { %1086 = vmax.xlane.f32.xlu0 %v1085_v63 }
 0x62b   : > { %v1082_v0 = vsel %vm475_vm2, %v1080_v62, -inf }
 0x62c   : > { %1083 = vmax.xlane.f32.xlu1 %v1082_v0 }
 0x6b3   : > { %v1087_v1 = vpop.xlane.xlu0 %1086 }
 0x6b4   : > { %v1089_v2 = vsub.f32 %v1081_v60, %v1087_v1 }
 0x6b5   : > { %v1084_v3 = vpop.xlane.xlu1 %1083 }
 0x6b6   : > { %v1092_v4 = vmul.f32 1.442695, %v1089_v2  ;;  %v1088_v5 = vsub.f32 %v1080_v62, %v1084_v3 }
 0x6b8   : > { %1500 = vpow2.f32 %v1092_v4  ;;  %v1090_v6 = vmul.f32 1.442695, %v1088_v5 }
 0x6ba   : > { %1502 = vpow2.f32 %v1090_v6 }
 0x6c5   : > { %v1501_v7 = vpop.eup %1500 }
 0x6c6   : > { %v1097_v29 = vsel %vm475_vm2, %v1501_v7, 0.0 }
 0x6c7   : > { %v1503_v9 = vpop.eup %1502  ;;  %1098 = vadd.xlane.f32.xlu1 %v1097_v29 }
 0x6c8   : > { %v1094_v30 = vsel %vm475_vm2, %v1503_v9, 0.0 }
 0x6c9   : > { %1095 = vadd.xlane.f32.xlu0 %v1094_v30 }
 0x6d8   : > { %1104 = vrot.lane.b32.xlu1 %v1597_v10, %s1527_s26 }
 0x6dc   : > { %1193 = vrot.lane.b32.xlu1 %v1681_v28, %s1528_s27 }
 0x6df   : > { %1106 = vrot.lane.b32.xlu0 %v1595_v8, %s1527_s26 }
 0x6e0   : > { %1201 = vrot.lane.b32.xlu1 %v980_v58, %s1529_s29 }
 0x6e3   : > { %1195 = vrot.lane.b32.xlu0 %v1679_v27, %s1528_s27 }
 0x6e7   : > { %1203 = vrot.lane.b32.xlu0 %v1436_v57, %s1529_s29 }
 0x750   : > { %v1099_v12 = vpop.xlane.xlu1 %1098 }
 0x751   : > { %1504 = vrcp.f32 %v1099_v12 }
 0x752   : > { %v1096_v14 = vpop.xlane.xlu0 %1095 }
 0x753   : > { %1506 = vrcp.f32 %v1096_v14 }
 0x754   : > { %v1105_v16 = vpop.permute.xlu1 %1104 }
 0x756   : > { %v1107_v15 = vpop.permute.xlu0 %1106 }
 0x757   : > { %1444 = vmatprep.subr.mxu0 %v1107_v15 }
 0x758   : > { %1445 = vmatpush3.msra.mxu0 %v1107_v15  ;;  %v1194_v22 = vpop.permute.xlu1 %1193 }
 0x759   : > { %1446 = vmatprep.subr.mxu0 %v1105_v16  ;;  %v1215_v34 = vsel %vm387_vm1, %v1677_v26, %v1194_v22 }
 0x75a   : > { %1447 = vmatpush3.msra.mxu0 %v1105_v16  ;;  %v1196_v21 = vpop.permute.xlu0 %1195 }
 0x75b   : > { %v1216_v31 = vsel %vm387_vm1, %v1675_v25, %v1196_v21 }
 0x75c   : > { %v1202_v28 = vpop.permute.xlu1 %1201 }
 0x75d   : > { %v1217_v36 = vsel %vm475_vm2, %v1215_v34, %v1202_v28 }
 0x75e   : > { %v1505_v10 = vpop.eup %1504  ;;  %v1204_v27 = vpop.permute.xlu0 %1203 }
 0x75f   : > { %v1103_v19 = vmul.f32 %v1505_v10, %v1501_v7  ;;  %v1218_v32 = vsel %vm475_vm2, %v1216_v31, %v1204_v27 }
 0x760   : > { %v1507_v17 = vpop.eup %1506 }
 0x761   : > { %v1102_v18 = vmul.f32 %v1507_v17, %v1503_v9 }
 0x763   : > { %1448 = vmatprep.mubr.msk.f32.mxu0 %vm475_vm2, %v1102_v18 }
 0x764   : > { %1449 = vmatmul.mubr.msk.f32.vlgmr.msra.gmra.mxu0 %vm475_vm2, %v1103_v19 }
 0x824   : > { %v1450_v8 = vpop.f32.mrf.mxu0 }
 0x825   : > { %1211 = vrot.lane.b32.xlu0 %v1450_v8, %s1530_s30 }
 0x826   : > { %v1182_v20 = vpop.f32.mrf.mxu0 }
 0x827   : > { %1209 = vrot.lane.b32.xlu1 %v1182_v20, %s1530_s30 }
 0x897   : > { %v1212_v33 = vpop.permute.xlu0 %1211 }
 0x898   : > { %v1221_v35 = vsel %vm1219_vm3, %v1218_v32, %v1212_v33 }
 0x899   : > { %v1223_v37 = vmul.f32 %v1221_v35, %v1633_v23  ;;  %v1210_v38 = vpop.permute.xlu1 %1209 }
 0x89a   : > { %v1220_v39 = vsel %vm1219_vm3, %v1217_v36, %v1210_v38 }
 0x89b   : > { %1225 = vst.msk [vmem:[%s258_s8 + $0x8] sm:$0xff] %vm275_vm0, %v1223_v37  ;;  %v1222_v25 = vmul.f32 %v1220_v39, %v1635_v24 }
 0x89d   : > { %1224 = vst.msk [vmem:[%s258_s8] sm:$0xff] %vm275_vm0, %v1222_v25 }
 0x89e PF: > { %s15_s18 = sadd.s32 1, %s1514_s18  }
 0x89f   : > { %p12_p4 = scmp.ge.s32.totalorder %s15_s18, 4  }
 0x8a1   :  { %14 = sbr.rel (!%p12_p4) target bundleno = 1 (0x1), region = 76 }

</bundles_post_ra>
